<compile_context>
chip_gen: v6e
topology: v6e:2x2x1
jax: 0.10.0
libtpu: 0.0.40
codegen_flags: <defaults>
</compile_context>

<pallas_src>
import functools

import jax
import jax.numpy as jnp
from jax import lax
from jax.experimental import pallas as pl
from jax.experimental.pallas import tpu as pltpu


# ----------------------------------------------------------------------------
# Fused Pallas kernel (one batch-tile of NB images per grid step):
#     conv3x3(pad=1, no bias) + BN(eval) + ReLU  ->  conv3x3 + BN(eval) + ReLU
# The intermediate activation never leaves VMEM.
#
# With the input presented as a channels-minor slab X of shape (H, W*Cin), a
# 'SAME' 3x3 conv is   out = sum_dy Xpad[dy:dy+H, :] @ BW[dy]   where Xpad has a
# zero row above/below and BW[dy] is a (W*Cin, W*Cout) block-Toeplitz matrix
# (built in the wrapper) encoding the three dx taps, the W padding and the
# folded BN scale.  NB images are stacked (each with its own zero pad rows) so
# the three tap matmuls run once with M = NB*(H+2)-2 rows.
# ----------------------------------------------------------------------------
def up_fused_conv_kernel(a_ref, b_ref, bwa_ref, bwb_ref, s1_ref, bw2_ref, s2_ref,
                         o_ref, xpa, xpb, xpm):
    # a_ref : (NB, H, W*C2)  bf16   x2 slab
    # b_ref : (NB, H, W*C1)  bf16   upsampled-x1 slab
    # bwa   : (3, W*C2, W*Cmid) bf16  Toeplitz weights, conv1 / x2 channels
    # bwb   : (3, W*C1, W*Cmid) bf16  Toeplitz weights, conv1 / x1 channels
    # s1    : (1, W*Cmid) f32        per-pixel-tiled BN shift, conv1
    # bw2   : (3, W*Cmid, W*Cout) bf16
    # s2    : (1, W*Cout) f32
    # o_ref : (NB, H, W*Cout)        lane-dense output slab
    # xpa/xpb/xpm : stacked per-image H-padded bf16 scratch, NB*(H+2) rows each
    NB, H = o_ref.shape[0], o_ref.shape[1]
    P = H + 2                       # padded rows per image
    M = NB * P - 2                  # rows per tap matmul / accumulator
    ka, kb, km = xpa.shape[1], xpb.shape[1], xpm.shape[1]
    kout = o_ref.shape[2]

    # ---- stage conv1 inputs (bf16, cast already done in the wrapper) --------
    # Per-step zero rows on purpose: an @pl.when(program_id==0) guard would be
    # wrong under "parallel" grid semantics (second core never sees step 0).
    for i in range(NB):                                   # static unroll
        base = i * P
        xpa[base:base + 1, :] = jnp.zeros((1, ka), xpa.dtype)
        xpa[base + 1:base + 1 + H, :] = a_ref[i]
        xpa[base + 1 + H:base + 2 + H, :] = jnp.zeros((1, ka), xpa.dtype)
        xpb[base:base + 1, :] = jnp.zeros((1, kb), xpb.dtype)
        xpb[base + 1:base + 1 + H, :] = b_ref[i]
        xpb[base + 1 + H:base + 2 + H, :] = jnp.zeros((1, kb), xpb.dtype)

    # ---- conv1: 3 taps x 2 source slabs (K just splits; no HBM concat) ------
    acc1 = jnp.zeros((M, km), jnp.float32)
    for dy in range(3):
        acc1 = acc1 + jnp.dot(xpa[dy:dy + M, :], bwa_ref[dy],
                              preferred_element_type=jnp.float32)
        acc1 = acc1 + jnp.dot(xpb[dy:dy + M, :], bwb_ref[dy],
                              preferred_element_type=jnp.float32)
    y1 = jnp.maximum(acc1 + s1_ref[...], 0.0).astype(xpm.dtype)   # f32 epilogue -> bf16

    # ---- stage conv2 input: one fat store, then (re)zero the pad rows -------
    # Rows base..base+H-1 of y1 are image i's conv1 output; the junk rows land
    # exactly on pad rows which get overwritten with zeros below.
    xpm[1:1 + M, :] = y1
    for i in range(NB):
        base = i * P
        xpm[base:base + 1, :] = jnp.zeros((1, km), xpm.dtype)
        xpm[base + 1 + H:base + 2 + H, :] = jnp.zeros((1, km), xpm.dtype)

    # ---- conv2 (intermediate stays in VMEM) ----------------------------------
    acc2 = jnp.zeros((M, kout), jnp.float32)
    for dy in range(3):
        acc2 = acc2 + jnp.dot(xpm[dy:dy + M, :], bw2_ref[dy],
                              preferred_element_type=jnp.float32)
    y2 = jnp.maximum(acc2 + s2_ref[...], 0.0)

    for i in range(NB):
        base = i * P
        o_ref[i] = y2[base:base + H].astype(o_ref.dtype)          # lane-dense store


# ----------------------------------------------------------------------------
# Wrapper-side weight preparation (one-time XLA ops, tiny tensors)
# ----------------------------------------------------------------------------
def _toeplitz_conv_weights(w_hwio, bn_scale, W):
    """BW[dy] of shape (W*Cin, W*Cout) so a 'SAME' 3x3 conv (no bias) with BN
    scale folded in equals sum_dy Xpad[dy:dy+H] @ BW[dy] on channels-minor
    (H, W*Cin) slabs.  W-padding handled by omitting out-of-range blocks."""
    kh, kw, cin, cout = w_hwio.shape
    wf = w_hwio.astype(jnp.float32) * bn_scale.astype(jnp.float32)[None, None, None, :]
    eye_w = jnp.eye(W, dtype=jnp.float32)
    mats = []
    for dy in range(kh):
        m = jnp.zeros((W * cin, W * cout), jnp.float32)
        for dx in range(kw):
            d = jnp.kron(eye_w, wf[dy, dx])            # block-diagonal (W*Cin, W*Cout)
            s = (dx - kw // 2) * cin                   # row shift (elements)
            if s > 0:
                d = jnp.concatenate(
                    [jnp.zeros((s, W * cout), jnp.float32), d[:-s]], axis=0)
            elif s < 0:
                d = jnp.concatenate(
                    [d[-s:], jnp.zeros((-s, W * cout), jnp.float32)], axis=0)
            m = m + d
        mats.append(m)
    return jnp.stack(mats, axis=0).astype(jnp.bfloat16)


def _pick_batch_tile(n, max_tile=8):
    """Largest divisor of n that is <= max_tile (images packed per grid step)."""
    for nb in range(min(n, max_tile), 0, -1):
        if n % nb == 0:
            return nb
    return 1


def conv_stack_pallas(x2_nhwc, x1u_nhwc, params, eps=1e-5):
    """Two fused (conv3x3 + BatchNorm(eval) + ReLU) layers in ONE pallas_call.
    Consumes the two concat operands separately (no HBM concat)."""
    N, H, W, c2 = x2_nhwc.shape
    c1 = x1u_nhwc.shape[-1]
    cmid = params["w1"].shape[-1]
    cout = params["w2"].shape[-1]
    out_dtype = x2_nhwc.dtype

    # Fold BatchNorm (inference semantics): scale -> weights, shift -> epilogue.
    s1 = params["g1"] / jnp.sqrt(params["v1"] + eps)
    b1 = params["b1"] - params["m1"] * s1
    s2 = params["g2"] / jnp.sqrt(params["v2"] + eps)
    b2 = params["b2"] - params["m2"] * s2

    # torch.cat([x2, x1], dim=1): first c2 input channels of w1 act on x2, the
    # remaining c1 on the upsampled x1 -> one Toeplitz block per operand.
    bwa = _toeplitz_conv_weights(params["w1"][:, :, :c2, :], s1, W)   # (3, W*c2,  W*cmid)
    bwb = _toeplitz_conv_weights(params["w1"][:, :, c2:, :], s1, W)   # (3, W*c1,  W*cmid)
    bw2 = _toeplitz_conv_weights(params["w2"], s2, W)                 # (3, W*cmid, W*cout)
    sh1 = jnp.tile(b1.astype(jnp.float32), W).reshape(1, W * cmid)
    sh2 = jnp.tile(b2.astype(jnp.float32), W).reshape(1, W * cout)

    # bf16 lane-dense slabs: half-width input DMA; f32 accumulation in-kernel.
    a2d = x2_nhwc.reshape(N, H, W * c2).astype(jnp.bfloat16)
    b2d = x1u_nhwc.reshape(N, H, W * c1).astype(jnp.bfloat16)

    NB = _pick_batch_tile(N)
    grid = (N // NB,)
    M = NB * (H + 2) - 2

    # Single-buffer the constant-index weight/shift inputs when there is more
    # than one grid step (default double-buffering would duplicate them in VMEM
    # for no benefit).  With a single step buffering is moot, so skip the knob.
    const_kwargs = {"pipeline_mode": pl.Buffered(1)} if grid[0] > 1 else {}

    itemsize_out = jnp.dtype(out_dtype).itemsize
    vmem_need = (
        2 * NB * H * W * (c1 + c2) * 2                 # double-buffered bf16 inputs
        + 2 * NB * H * W * cout * itemsize_out         # double-buffered output
        + (bwa.size + bwb.size + bw2.size) * 2         # bf16 weights (single-buffered)
        + (sh1.size + sh2.size) * 4
        + NB * (H + 2) * W * (c1 + c2 + cmid) * 2      # bf16 scratch
    )
    vmem_limit = int(min(max(2 * vmem_need, 8 << 20), 100 << 20))

    flops = int(grid[0] * 3 * 2 * M
                * (W * (c1 + c2) * W * cmid + W * cmid * W * cout))
    bytes_accessed = int(a2d.size * 2 + b2d.size * 2
                         + (bwa.size + bwb.size + bw2.size) * 2
                         + (sh1.size + sh2.size) * 4
                         + N * H * W * cout * itemsize_out)

    # TODO(synk): for real UNet sizes (large H, W, C) the W-spanning Toeplitz
    # weights scale as W^2; switch to W-banded tiles (1-pixel halo) or the
    # 9-tap (H*W, Cin)@(Cin, Cout) formulation, and add an H-band "parallel"
    # grid axis (2-row halo) so v7x's two TensorCores stay balanced.
    out2d = pl.pallas_call(
        up_fused_conv_kernel,
        out_shape=jax.ShapeDtypeStruct((N, H, W * cout), out_dtype),
        grid_spec=pltpu.PrefetchScalarGridSpec(
            num_scalar_prefetch=0,
            grid=grid,
            in_specs=[
                pl.BlockSpec((NB, H, W * c2), lambda g: (g, 0, 0)),
                pl.BlockSpec((NB, H, W * c1), lambda g: (g, 0, 0)),
                pl.BlockSpec((3, W * c2, W * cmid), lambda g: (0, 0, 0),
                             **const_kwargs),
                pl.BlockSpec((3, W * c1, W * cmid), lambda g: (0, 0, 0),
                             **const_kwargs),
                pl.BlockSpec((1, W * cmid), lambda g: (0, 0), **const_kwargs),
                pl.BlockSpec((3, W * cmid, W * cout), lambda g: (0, 0, 0),
                             **const_kwargs),
                pl.BlockSpec((1, W * cout), lambda g: (0, 0), **const_kwargs),
            ],
            out_specs=pl.BlockSpec((NB, H, W * cout), lambda g: (g, 0, 0)),
            scratch_shapes=[
                pltpu.VMEM((NB * (H + 2), W * c2), jnp.bfloat16),
                pltpu.VMEM((NB * (H + 2), W * c1), jnp.bfloat16),
                pltpu.VMEM((NB * (H + 2), W * cmid), jnp.bfloat16),
            ],
        ),
        compiler_params=pltpu.CompilerParams(
            dimension_semantics=("parallel",),
            vmem_limit_bytes=vmem_limit),
        cost_estimate=pl.CostEstimate(flops=flops, transcendentals=0,
                                      bytes_accessed=bytes_accessed),
    )(a2d, b2d, bwa, bwb, sh1, bw2, sh2)

    return out2d.reshape(N, H, W, cout)


# ----------------------------------------------------------------------------
# Glue: bilinear upsample (align_corners=True), full forward
# TODO(synk): the gather-based upsample and the NCHW<->NHWC transposes stay in
# plain XLA; longer term fold the upsample into the kernel via scalar-prefetched
# y0/y1/x0/x1 indices + weights.
# ----------------------------------------------------------------------------
def upsample_bilinear_align_corners(x_nhwc, scale_factor):
    """nn.Upsample(scale_factor, mode='bilinear', align_corners=True) in NHWC."""
    N, H, W, C = x_nhwc.shape
    Ho, Wo = H * scale_factor, W * scale_factor

    def coords(out_size, in_size):
        if out_size == 1:
            return jnp.zeros((out_size,), jnp.float32)
        return jnp.arange(out_size, dtype=jnp.float32) * (
            (in_size - 1) / (out_size - 1))

    ys = coords(Ho, H)
    xs = coords(Wo, W)
    y0 = jnp.clip(jnp.floor(ys).astype(jnp.int32), 0, H - 1)
    y1 = jnp.clip(y0 + 1, 0, H - 1)
    wy = (ys - y0.astype(jnp.float32))[None, :, None, None]
    x0 = jnp.clip(jnp.floor(xs).astype(jnp.int32), 0, W - 1)
    x1 = jnp.clip(x0 + 1, 0, W - 1)
    wx = (xs - x0.astype(jnp.float32))[None, None, :, None]

    rows = x_nhwc[:, y0] * (1.0 - wy) + x_nhwc[:, y1] * wy        # (N, Ho, W, C)
    out = rows[:, :, x0] * (1.0 - wx) + rows[:, :, x1] * wx       # (N, Ho, Wo, C)
    return out


def up_forward(x1_nchw, x2_nchw, params, scale_factor=2):
    """Equivalent of Up.forward (BatchNorm in eval mode). Returns NCHW."""
    x1 = jnp.transpose(x1_nchw, (0, 2, 3, 1))  # NHWC
    x2 = jnp.transpose(x2_nchw, (0, 2, 3, 1))  # NHWC
    x1 = upsample_bilinear_align_corners(x1, scale_factor)
    # torch.cat([x2, x1], dim=1) is folded into the kernel (no HBM concat).
    y = conv_stack_pallas(x2, x1, params)
    return jnp.transpose(y, (0, 3, 1, 2))      # back to NCHW


# ----------------------------------------------------------------------------
# Pure-JAX reference (f32, HIGHEST precision) for the correctness check
# ----------------------------------------------------------------------------
def conv_bn_relu_ref(x_nhwc, w_hwio, gamma, beta, mean, var, eps=1e-5):
    y = lax.conv_general_dilated(
        x_nhwc, w_hwio, (1, 1), "SAME",
        dimension_numbers=("NHWC", "HWIO", "NHWC"),
        precision=lax.Precision.HIGHEST)
    scale = gamma / jnp.sqrt(var + eps)
    shift = beta - mean * scale
    return jnp.maximum(y * scale + shift, 0.0)


def up_forward_ref(x1_nchw, x2_nchw, params, scale_factor=2):
    x1 = jnp.transpose(x1_nchw, (0, 2, 3, 1))
    x2 = jnp.transpose(x2_nchw, (0, 2, 3, 1))
    x1 = upsample_bilinear_align_corners(x1, scale_factor)
    x = jnp.concatenate([x2, x1], axis=-1)
    y = conv_bn_relu_ref(x, params["w1"], params["g1"], params["b1"],
                         params["m1"], params["v1"])
    y = conv_bn_relu_ref(y, params["w2"], params["g2"], params["b2"],
                         params["m2"], params["v2"])
    return jnp.transpose(y, (0, 3, 1, 2))


# ----------------------------------------------------------------------------
# Main
# ----------------------------------------------------------------------------
if __name__ == "__main__":
    key = jax.random.PRNGKey(0)
    (k_x1, k_x2, k_w1, k_w2, k_g1, k_b1, k_m1, k_v1,
     k_g2, k_b2, k_m2, k_v2) = jax.random.split(key, 12)

    # Shapes consistent with Up(in_channels=8, out_channels=4, scale=2):
    # x1: (N, 4, 16, 16) upsampled to 32x32; x2: (N, 4, 32, 32);
    # concat -> 8 channels -> conv stack -> 4 channels.
    N, C1, C2, H1, S = 2, 4, 4, 16, 2
    Cin, Cout = C1 + C2, 4
    H2 = H1 * S

    x1 = jax.random.normal(k_x1, (N, C1, H1, H1), jnp.float32)
    x2 = jax.random.normal(k_x2, (N, C2, H2, H2), jnp.float32)

    params = {
        "w1": jax.random.normal(k_w1, (3, 3, Cin, Cout), jnp.float32) * 0.2,
        "g1": 1.0 + 0.1 * jax.random.normal(k_g1, (Cout,), jnp.float32),
        "b1": 0.1 * jax.random.normal(k_b1, (Cout,), jnp.float32),
        "m1": 0.1 * jax.random.normal(k_m1, (Cout,), jnp.float32),
        "v1": 0.5 + jnp.abs(jax.random.normal(k_v1, (Cout,), jnp.float32)),
        "w2": jax.random.normal(k_w2, (3, 3, Cout, Cout), jnp.float32) * 0.2,
        "g2": 1.0 + 0.1 * jax.random.normal(k_g2, (Cout,), jnp.float32),
        "b2": 0.1 * jax.random.normal(k_b2, (Cout,), jnp.float32),
        "m2": 0.1 * jax.random.normal(k_m2, (Cout,), jnp.float32),
        "v2": 0.5 + jnp.abs(jax.random.normal(k_v2, (Cout,), jnp.float32)),
    }

    out = jax.jit(functools.partial(up_forward, scale_factor=S))(x1, x2, params)
    out = jax.block_until_ready(out)
    assert out.shape == (N, Cout, H2, H2), out.shape

    ref = jax.block_until_ready(up_forward_ref(x1, x2, params, S))
    # Intentional precision contract: bf16 MXU operands (inputs, weights, and
    # the conv1->conv2 intermediate) with f32 accumulation; compare against the
    # f32 HIGHEST reference with a correspondingly looser bound.
    abs_err = float(jnp.max(jnp.abs(out - ref)))
    ref_mag = float(jnp.max(jnp.abs(ref)))
    assert abs_err <= 5e-2 * ref_mag + 1e-3, (abs_err, ref_mag)

    print("KERNEL_OK")
</pallas_src>

<mosaic_0001>
module attributes {stable_mosaic.version = 11 : i64} {
  func.func @up_fused_conv_kernel(%arg0: i32, %arg1: memref<2x32x128xbf16, #tpu.memory_space<vmem>>, %arg2: memref<2x32x128xbf16, #tpu.memory_space<vmem>>, %arg3: memref<3x128x128xbf16, #tpu.memory_space<vmem>>, %arg4: memref<3x128x128xbf16, #tpu.memory_space<vmem>>, %arg5: memref<1x128xf32, #tpu.memory_space<vmem>>, %arg6: memref<3x128x128xbf16, #tpu.memory_space<vmem>>, %arg7: memref<1x128xf32, #tpu.memory_space<vmem>>, %arg8: memref<2x32x128xf32, #tpu.memory_space<vmem>>, %arg9: memref<68x128xbf16, #tpu.memory_space<vmem>>, %arg10: memref<68x128xbf16, #tpu.memory_space<vmem>>, %arg11: memref<68x128xbf16, #tpu.memory_space<vmem>>) attributes {dimension_semantics = [#tpu.dimension_semantics<parallel>], iteration_bounds = array<i64: 1>, scalar_prefetch = 0 : i64, scratch_operands = 3 : i64, tpu.core_type = #tpu.core_type<tc>, window_params = [{transform_indices = @transform_0, window_bounds = array<i64: 2, 32, 128>}, {transform_indices = @transform_1, window_bounds = array<i64: 2, 32, 128>}, {pipeline_mode = #tpu.pipeline_mode<synchronous>, transform_indices = @transform_2, window_bounds = array<i64: 3, 128, 128>}, {pipeline_mode = #tpu.pipeline_mode<synchronous>, transform_indices = @transform_3, window_bounds = array<i64: 3, 128, 128>}, {pipeline_mode = #tpu.pipeline_mode<synchronous>, transform_indices = @transform_4, window_bounds = array<i64: 1, 128>}, {pipeline_mode = #tpu.pipeline_mode<synchronous>, transform_indices = @transform_5, window_bounds = array<i64: 3, 128, 128>}, {pipeline_mode = #tpu.pipeline_mode<synchronous>, transform_indices = @transform_6, window_bounds = array<i64: 1, 128>}, {transform_indices = @transform_7, window_bounds = array<i64: 2, 32, 128>}]} {
    %cst = arith.constant 0.000000e+00 : bf16
    %0 = vector.broadcast %cst : bf16 to vector<1x128xbf16>
    %c0 = arith.constant 0 : index
    %c0_0 = arith.constant 0 : index
    %1 = vector.load %arg9[%c0, %c0_0] : memref<68x128xbf16, #tpu.memory_space<vmem>>, vector<1x128xbf16>
    tpu.vector_store %arg9[%c0, %c0_0], %0 {strides = array<i32>} : memref<68x128xbf16, #tpu.memory_space<vmem>>, vector<1x128xbf16>,
    %c0_1 = arith.constant 0 : index
    %c0_2 = arith.constant 0 : index
    %c0_3 = arith.constant 0 : index
    %2 = vector.load %arg1[%c0_1, %c0_2, %c0_3] : memref<2x32x128xbf16, #tpu.memory_space<vmem>>, vector<1x32x128xbf16>
    %3 = vector.shape_cast %2 : vector<1x32x128xbf16> to vector<32x128xbf16>
    %c1 = arith.constant 1 : index
    %c0_4 = arith.constant 0 : index
    %4 = vector.load %arg9[%c1, %c0_4] : memref<68x128xbf16, #tpu.memory_space<vmem>>, vector<32x128xbf16>
    tpu.vector_store %arg9[%c1, %c0_4], %3 {strides = array<i32>} : memref<68x128xbf16, #tpu.memory_space<vmem>>, vector<32x128xbf16>,
    %cst_5 = arith.constant 0.000000e+00 : bf16
    %5 = vector.broadcast %cst_5 : bf16 to vector<1x128xbf16>
    %c33 = arith.constant 33 : index
    %c0_6 = arith.constant 0 : index
    %6 = vector.load %arg9[%c33, %c0_6] : memref<68x128xbf16, #tpu.memory_space<vmem>>, vector<1x128xbf16>
    tpu.vector_store %arg9[%c33, %c0_6], %5 {strides = array<i32>} : memref<68x128xbf16, #tpu.memory_space<vmem>>, vector<1x128xbf16>,
    %cst_7 = arith.constant 0.000000e+00 : bf16
    %7 = vector.broadcast %cst_7 : bf16 to vector<1x128xbf16>
    %c0_8 = arith.constant 0 : index
    %c0_9 = arith.constant 0 : index
    %8 = vector.load %arg10[%c0_8, %c0_9] : memref<68x128xbf16, #tpu.memory_space<vmem>>, vector<1x128xbf16>
    tpu.vector_store %arg10[%c0_8, %c0_9], %7 {strides = array<i32>} : memref<68x128xbf16, #tpu.memory_space<vmem>>, vector<1x128xbf16>,
    %c0_10 = arith.constant 0 : index
    %c0_11 = arith.constant 0 : index
    %c0_12 = arith.constant 0 : index
    %9 = vector.load %arg2[%c0_10, %c0_11, %c0_12] : memref<2x32x128xbf16, #tpu.memory_space<vmem>>, vector<1x32x128xbf16>
    %10 = vector.shape_cast %9 : vector<1x32x128xbf16> to vector<32x128xbf16>
    %c1_13 = arith.constant 1 : index
    %c0_14 = arith.constant 0 : index
    %11 = vector.load %arg10[%c1_13, %c0_14] : memref<68x128xbf16, #tpu.memory_space<vmem>>, vector<32x128xbf16>
    tpu.vector_store %arg10[%c1_13, %c0_14], %10 {strides = array<i32>} : memref<68x128xbf16, #tpu.memory_space<vmem>>, vector<32x128xbf16>,
    %cst_15 = arith.constant 0.000000e+00 : bf16
    %12 = vector.broadcast %cst_15 : bf16 to vector<1x128xbf16>
    %c33_16 = arith.constant 33 : index
    %c0_17 = arith.constant 0 : index
    %13 = vector.load %arg10[%c33_16, %c0_17] : memref<68x128xbf16, #tpu.memory_space<vmem>>, vector<1x128xbf16>
    tpu.vector_store %arg10[%c33_16, %c0_17], %12 {strides = array<i32>} : memref<68x128xbf16, #tpu.memory_space<vmem>>, vector<1x128xbf16>,
    %cst_18 = arith.constant 0.000000e+00 : bf16
    %14 = vector.broadcast %cst_18 : bf16 to vector<1x128xbf16>
    %c34 = arith.constant 34 : index
    %c0_19 = arith.constant 0 : index
    %15 = vector.load %arg9[%c34, %c0_19] : memref<68x128xbf16, #tpu.memory_space<vmem>>, vector<1x128xbf16>
    tpu.vector_store %arg9[%c34, %c0_19], %14 {strides = array<i32>} : memref<68x128xbf16, #tpu.memory_space<vmem>>, vector<1x128xbf16>,
    %c1_20 = arith.constant 1 : index
    %c0_21 = arith.constant 0 : index
    %c0_22 = arith.constant 0 : index
    %16 = vector.load %arg1[%c1_20, %c0_21, %c0_22] : memref<2x32x128xbf16, #tpu.memory_space<vmem>>, vector<1x32x128xbf16>
    %17 = vector.shape_cast %16 : vector<1x32x128xbf16> to vector<32x128xbf16>
    %c35 = arith.constant 35 : index
    %c0_23 = arith.constant 0 : index
    %18 = vector.load %arg9[%c35, %c0_23] : memref<68x128xbf16, #tpu.memory_space<vmem>>, vector<32x128xbf16>
    tpu.vector_store %arg9[%c35, %c0_23], %17 {strides = array<i32>} : memref<68x128xbf16, #tpu.memory_space<vmem>>, vector<32x128xbf16>,
    %cst_24 = arith.constant 0.000000e+00 : bf16
    %19 = vector.broadcast %cst_24 : bf16 to vector<1x128xbf16>
    %c67 = arith.constant 67 : index
    %c0_25 = arith.constant 0 : index
    %20 = vector.load %arg9[%c67, %c0_25] : memref<68x128xbf16, #tpu.memory_space<vmem>>, vector<1x128xbf16>
    tpu.vector_store %arg9[%c67, %c0_25], %19 {strides = array<i32>} : memref<68x128xbf16, #tpu.memory_space<vmem>>, vector<1x128xbf16>,
    %cst_26 = arith.constant 0.000000e+00 : bf16
    %21 = vector.broadcast %cst_26 : bf16 to vector<1x128xbf16>
    %c34_27 = arith.constant 34 : index
    %c0_28 = arith.constant 0 : index
    %22 = vector.load %arg10[%c34_27, %c0_28] : memref<68x128xbf16, #tpu.memory_space<vmem>>, vector<1x128xbf16>
    tpu.vector_store %arg10[%c34_27, %c0_28], %21 {strides = array<i32>} : memref<68x128xbf16, #tpu.memory_space<vmem>>, vector<1x128xbf16>,
    %c1_29 = arith.constant 1 : index
    %c0_30 = arith.constant 0 : index
    %c0_31 = arith.constant 0 : index
    %23 = vector.load %arg2[%c1_29, %c0_30, %c0_31] : memref<2x32x128xbf16, #tpu.memory_space<vmem>>, vector<1x32x128xbf16>
    %24 = vector.shape_cast %23 : vector<1x32x128xbf16> to vector<32x128xbf16>
    %c35_32 = arith.constant 35 : index
    %c0_33 = arith.constant 0 : index
    %25 = vector.load %arg10[%c35_32, %c0_33] : memref<68x128xbf16, #tpu.memory_space<vmem>>, vector<32x128xbf16>
    tpu.vector_store %arg10[%c35_32, %c0_33], %24 {strides = array<i32>} : memref<68x128xbf16, #tpu.memory_space<vmem>>, vector<32x128xbf16>,
    %cst_34 = arith.constant 0.000000e+00 : bf16
    %26 = vector.broadcast %cst_34 : bf16 to vector<1x128xbf16>
    %c67_35 = arith.constant 67 : index
    %c0_36 = arith.constant 0 : index
    %27 = vector.load %arg10[%c67_35, %c0_36] : memref<68x128xbf16, #tpu.memory_space<vmem>>, vector<1x128xbf16>
    tpu.vector_store %arg10[%c67_35, %c0_36], %26 {strides = array<i32>} : memref<68x128xbf16, #tpu.memory_space<vmem>>, vector<1x128xbf16>,
    %cst_37 = arith.constant 0.000000e+00 : f32
    %28 = vector.broadcast %cst_37 : f32 to vector<66x128xf32>
    %c0_38 = arith.constant 0 : index
    %c0_39 = arith.constant 0 : index
    %29 = vector.load %arg9[%c0_38, %c0_39] : memref<68x128xbf16, #tpu.memory_space<vmem>>, vector<66x128xbf16>
    %c0_40 = arith.constant 0 : index
    %c0_41 = arith.constant 0 : index
    %c0_42 = arith.constant 0 : index
    %30 = vector.load %arg3[%c0_40, %c0_41, %c0_42] : memref<3x128x128xbf16, #tpu.memory_space<vmem>>, vector<1x128x128xbf16>
    %31 = vector.shape_cast %30 : vector<1x128x128xbf16> to vector<128x128xbf16>
    %cst_43 = arith.constant dense<0.000000e+00> : vector<66x128xf32>
    %32 = tpu.matmul %29, %31, %cst_43 {dimension_numbers = #tpu.dot_dimension_numbers<[1], [0], [0], [1], [0, 0, 1, 1], [], []>} : vector<66x128xbf16>, vector<128x128xbf16>, vector<66x128xf32> -> vector<66x128xf32>
    %33 = arith.addf %28, %32 : vector<66x128xf32>
    %c0_44 = arith.constant 0 : index
    %c0_45 = arith.constant 0 : index
    %34 = vector.load %arg10[%c0_44, %c0_45] : memref<68x128xbf16, #tpu.memory_space<vmem>>, vector<66x128xbf16>
    %c0_46 = arith.constant 0 : index
    %c0_47 = arith.constant 0 : index
    %c0_48 = arith.constant 0 : index
    %35 = vector.load %arg4[%c0_46, %c0_47, %c0_48] : memref<3x128x128xbf16, #tpu.memory_space<vmem>>, vector<1x128x128xbf16>
    %36 = vector.shape_cast %35 : vector<1x128x128xbf16> to vector<128x128xbf16>
    %cst_49 = arith.constant dense<0.000000e+00> : vector<66x128xf32>
    %37 = tpu.matmul %34, %36, %cst_49 {dimension_numbers = #tpu.dot_dimension_numbers<[1], [0], [0], [1], [0, 0, 1, 1], [], []>} : vector<66x128xbf16>, vector<128x128xbf16>, vector<66x128xf32> -> vector<66x128xf32>
    %38 = arith.addf %33, %37 : vector<66x128xf32>
    %c1_50 = arith.constant 1 : index
    %c0_51 = arith.constant 0 : index
    %39 = vector.load %arg9[%c1_50, %c0_51] : memref<68x128xbf16, #tpu.memory_space<vmem>>, vector<66x128xbf16>
    %c1_52 = arith.constant 1 : index
    %c0_53 = arith.constant 0 : index
    %c0_54 = arith.constant 0 : index
    %40 = vector.load %arg3[%c1_52, %c0_53, %c0_54] : memref<3x128x128xbf16, #tpu.memory_space<vmem>>, vector<1x128x128xbf16>
    %41 = vector.shape_cast %40 : vector<1x128x128xbf16> to vector<128x128xbf16>
    %cst_55 = arith.constant dense<0.000000e+00> : vector<66x128xf32>
    %42 = tpu.matmul %39, %41, %cst_55 {dimension_numbers = #tpu.dot_dimension_numbers<[1], [0], [0], [1], [0, 0, 1, 1], [], []>} : vector<66x128xbf16>, vector<128x128xbf16>, vector<66x128xf32> -> vector<66x128xf32>
    %43 = arith.addf %38, %42 : vector<66x128xf32>
    %c1_56 = arith.constant 1 : index
    %c0_57 = arith.constant 0 : index
    %44 = vector.load %arg10[%c1_56, %c0_57] : memref<68x128xbf16, #tpu.memory_space<vmem>>, vector<66x128xbf16>
    %c1_58 = arith.constant 1 : index
    %c0_59 = arith.constant 0 : index
    %c0_60 = arith.constant 0 : index
    %45 = vector.load %arg4[%c1_58, %c0_59, %c0_60] : memref<3x128x128xbf16, #tpu.memory_space<vmem>>, vector<1x128x128xbf16>
    %46 = vector.shape_cast %45 : vector<1x128x128xbf16> to vector<128x128xbf16>
    %cst_61 = arith.constant dense<0.000000e+00> : vector<66x128xf32>
    %47 = tpu.matmul %44, %46, %cst_61 {dimension_numbers = #tpu.dot_dimension_numbers<[1], [0], [0], [1], [0, 0, 1, 1], [], []>} : vector<66x128xbf16>, vector<128x128xbf16>, vector<66x128xf32> -> vector<66x128xf32>
    %48 = arith.addf %43, %47 : vector<66x128xf32>
    %c2 = arith.constant 2 : index
    %c0_62 = arith.constant 0 : index
    %49 = vector.load %arg9[%c2, %c0_62] : memref<68x128xbf16, #tpu.memory_space<vmem>>, vector<66x128xbf16>
    %c2_63 = arith.constant 2 : index
    %c0_64 = arith.constant 0 : index
    %c0_65 = arith.constant 0 : index
    %50 = vector.load %arg3[%c2_63, %c0_64, %c0_65] : memref<3x128x128xbf16, #tpu.memory_space<vmem>>, vector<1x128x128xbf16>
    %51 = vector.shape_cast %50 : vector<1x128x128xbf16> to vector<128x128xbf16>
    %cst_66 = arith.constant dense<0.000000e+00> : vector<66x128xf32>
    %52 = tpu.matmul %49, %51, %cst_66 {dimension_numbers = #tpu.dot_dimension_numbers<[1], [0], [0], [1], [0, 0, 1, 1], [], []>} : vector<66x128xbf16>, vector<128x128xbf16>, vector<66x128xf32> -> vector<66x128xf32>
    %53 = arith.addf %48, %52 : vector<66x128xf32>
    %c2_67 = arith.constant 2 : index
    %c0_68 = arith.constant 0 : index
    %54 = vector.load %arg10[%c2_67, %c0_68] : memref<68x128xbf16, #tpu.memory_space<vmem>>, vector<66x128xbf16>
    %c2_69 = arith.constant 2 : index
    %c0_70 = arith.constant 0 : index
    %c0_71 = arith.constant 0 : index
    %55 = vector.load %arg4[%c2_69, %c0_70, %c0_71] : memref<3x128x128xbf16, #tpu.memory_space<vmem>>, vector<1x128x128xbf16>
    %56 = vector.shape_cast %55 : vector<1x128x128xbf16> to vector<128x128xbf16>
    %cst_72 = arith.constant dense<0.000000e+00> : vector<66x128xf32>
    %57 = tpu.matmul %54, %56, %cst_72 {dimension_numbers = #tpu.dot_dimension_numbers<[1], [0], [0], [1], [0, 0, 1, 1], [], []>} : vector<66x128xbf16>, vector<128x128xbf16>, vector<66x128xf32> -> vector<66x128xf32>
    %58 = arith.addf %53, %57 : vector<66x128xf32>
    %c0_73 = arith.constant 0 : index
    %c0_74 = arith.constant 0 : index
    %59 = vector.load %arg5[%c0_73, %c0_74] : memref<1x128xf32, #tpu.memory_space<vmem>>, vector<1x128xf32>
    %60 = vector.broadcast %59 : vector<1x128xf32> to vector<66x128xf32>
    %61 = arith.addf %58, %60 : vector<66x128xf32>
    %cst_75 = arith.constant 0.000000e+00 : f32
    %62 = vector.broadcast %cst_75 : f32 to vector<66x128xf32>
    %63 = arith.maximumf %61, %62 : vector<66x128xf32>
    %64 = arith.truncf %63 : vector<66x128xf32> to vector<66x128xbf16>
    %c1_76 = arith.constant 1 : index
    %c0_77 = arith.constant 0 : index
    %65 = vector.load %arg11[%c1_76, %c0_77] : memref<68x128xbf16, #tpu.memory_space<vmem>>, vector<66x128xbf16>
    tpu.vector_store %arg11[%c1_76, %c0_77], %64 {strides = array<i32>} : memref<68x128xbf16, #tpu.memory_space<vmem>>, vector<66x128xbf16>,
    %cst_78 = arith.constant 0.000000e+00 : bf16
    %66 = vector.broadcast %cst_78 : bf16 to vector<1x128xbf16>
    %c0_79 = arith.constant 0 : index
    %c0_80 = arith.constant 0 : index
    %67 = vector.load %arg11[%c0_79, %c0_80] : memref<68x128xbf16, #tpu.memory_space<vmem>>, vector<1x128xbf16>
    tpu.vector_store %arg11[%c0_79, %c0_80], %66 {strides = array<i32>} : memref<68x128xbf16, #tpu.memory_space<vmem>>, vector<1x128xbf16>,
    %cst_81 = arith.constant 0.000000e+00 : bf16
    %68 = vector.broadcast %cst_81 : bf16 to vector<1x128xbf16>
    %c33_82 = arith.constant 33 : index
    %c0_83 = arith.constant 0 : index
    %69 = vector.load %arg11[%c33_82, %c0_83] : memref<68x128xbf16, #tpu.memory_space<vmem>>, vector<1x128xbf16>
    tpu.vector_store %arg11[%c33_82, %c0_83], %68 {strides = array<i32>} : memref<68x128xbf16, #tpu.memory_space<vmem>>, vector<1x128xbf16>,
    %cst_84 = arith.constant 0.000000e+00 : bf16
    %70 = vector.broadcast %cst_84 : bf16 to vector<1x128xbf16>
    %c34_85 = arith.constant 34 : index
    %c0_86 = arith.constant 0 : index
    %71 = vector.load %arg11[%c34_85, %c0_86] : memref<68x128xbf16, #tpu.memory_space<vmem>>, vector<1x128xbf16>
    tpu.vector_store %arg11[%c34_85, %c0_86], %70 {strides = array<i32>} : memref<68x128xbf16, #tpu.memory_space<vmem>>, vector<1x128xbf16>,
    %cst_87 = arith.constant 0.000000e+00 : bf16
    %72 = vector.broadcast %cst_87 : bf16 to vector<1x128xbf16>
    %c67_88 = arith.constant 67 : index
    %c0_89 = arith.constant 0 : index
    %73 = vector.load %arg11[%c67_88, %c0_89] : memref<68x128xbf16, #tpu.memory_space<vmem>>, vector<1x128xbf16>
    tpu.vector_store %arg11[%c67_88, %c0_89], %72 {strides = array<i32>} : memref<68x128xbf16, #tpu.memory_space<vmem>>, vector<1x128xbf16>,
    %cst_90 = arith.constant 0.000000e+00 : f32
    %74 = vector.broadcast %cst_90 : f32 to vector<66x128xf32>
    %c0_91 = arith.constant 0 : index
    %c0_92 = arith.constant 0 : index
    %75 = vector.load %arg11[%c0_91, %c0_92] : memref<68x128xbf16, #tpu.memory_space<vmem>>, vector<66x128xbf16>
    %c0_93 = arith.constant 0 : index
    %c0_94 = arith.constant 0 : index
    %c0_95 = arith.constant 0 : index
    %76 = vector.load %arg6[%c0_93, %c0_94, %c0_95] : memref<3x128x128xbf16, #tpu.memory_space<vmem>>, vector<1x128x128xbf16>
    %77 = vector.shape_cast %76 : vector<1x128x128xbf16> to vector<128x128xbf16>
    %cst_96 = arith.constant dense<0.000000e+00> : vector<66x128xf32>
    %78 = tpu.matmul %75, %77, %cst_96 {dimension_numbers = #tpu.dot_dimension_numbers<[1], [0], [0], [1], [0, 0, 1, 1], [], []>} : vector<66x128xbf16>, vector<128x128xbf16>, vector<66x128xf32> -> vector<66x128xf32>
    %79 = arith.addf %74, %78 : vector<66x128xf32>
    %c1_97 = arith.constant 1 : index
    %c0_98 = arith.constant 0 : index
    %80 = vector.load %arg11[%c1_97, %c0_98] : memref<68x128xbf16, #tpu.memory_space<vmem>>, vector<66x128xbf16>
    %c1_99 = arith.constant 1 : index
    %c0_100 = arith.constant 0 : index
    %c0_101 = arith.constant 0 : index
    %81 = vector.load %arg6[%c1_99, %c0_100, %c0_101] : memref<3x128x128xbf16, #tpu.memory_space<vmem>>, vector<1x128x128xbf16>
    %82 = vector.shape_cast %81 : vector<1x128x128xbf16> to vector<128x128xbf16>
    %cst_102 = arith.constant dense<0.000000e+00> : vector<66x128xf32>
    %83 = tpu.matmul %80, %82, %cst_102 {dimension_numbers = #tpu.dot_dimension_numbers<[1], [0], [0], [1], [0, 0, 1, 1], [], []>} : vector<66x128xbf16>, vector<128x128xbf16>, vector<66x128xf32> -> vector<66x128xf32>
    %84 = arith.addf %79, %83 : vector<66x128xf32>
    %c2_103 = arith.constant 2 : index
    %c0_104 = arith.constant 0 : index
    %85 = vector.load %arg11[%c2_103, %c0_104] : memref<68x128xbf16, #tpu.memory_space<vmem>>, vector<66x128xbf16>
    %c2_105 = arith.constant 2 : index
    %c0_106 = arith.constant 0 : index
    %c0_107 = arith.constant 0 : index
    %86 = vector.load %arg6[%c2_105, %c0_106, %c0_107] : memref<3x128x128xbf16, #tpu.memory_space<vmem>>, vector<1x128x128xbf16>
    %87 = vector.shape_cast %86 : vector<1x128x128xbf16> to vector<128x128xbf16>
    %cst_108 = arith.constant dense<0.000000e+00> : vector<66x128xf32>
    %88 = tpu.matmul %85, %87, %cst_108 {dimension_numbers = #tpu.dot_dimension_numbers<[1], [0], [0], [1], [0, 0, 1, 1], [], []>} : vector<66x128xbf16>, vector<128x128xbf16>, vector<66x128xf32> -> vector<66x128xf32>
    %89 = arith.addf %84, %88 : vector<66x128xf32>
    %c0_109 = arith.constant 0 : index
    %c0_110 = arith.constant 0 : index
    %90 = vector.load %arg7[%c0_109, %c0_110] : memref<1x128xf32, #tpu.memory_space<vmem>>, vector<1x128xf32>
    %91 = vector.broadcast %90 : vector<1x128xf32> to vector<66x128xf32>
    %92 = arith.addf %89, %91 : vector<66x128xf32>
    %cst_111 = arith.constant 0.000000e+00 : f32
    %93 = vector.broadcast %cst_111 : f32 to vector<66x128xf32>
    %94 = arith.maximumf %92, %93 : vector<66x128xf32>
    %95 = vector.extract_strided_slice %94 {offsets = [0, 0], sizes = [32, 128], strides = [1, 1]} : vector<66x128xf32> to vector<32x128xf32>
    %c0_112 = arith.constant 0 : index
    %c0_113 = arith.constant 0 : index
    %c0_114 = arith.constant 0 : index
    %96 = vector.load %arg8[%c0_112, %c0_113, %c0_114] : memref<2x32x128xf32, #tpu.memory_space<vmem>>, vector<1x32x128xf32>
    %97 = vector.shape_cast %96 : vector<1x32x128xf32> to vector<32x128xf32>
    %98 = vector.shape_cast %95 : vector<32x128xf32> to vector<1x32x128xf32>
    tpu.vector_store %arg8[%c0_112, %c0_113, %c0_114], %98 {strides = array<i32>} : memref<2x32x128xf32, #tpu.memory_space<vmem>>, vector<1x32x128xf32>,
    %99 = vector.extract_strided_slice %94 {offsets = [34, 0], sizes = [32, 128], strides = [1, 1]} : vector<66x128xf32> to vector<32x128xf32>
    %c1_115 = arith.constant 1 : index
    %c0_116 = arith.constant 0 : index
    %c0_117 = arith.constant 0 : index
    %100 = vector.load %arg8[%c1_115, %c0_116, %c0_117] : memref<2x32x128xf32, #tpu.memory_space<vmem>>, vector<1x32x128xf32>
    %101 = vector.shape_cast %100 : vector<1x32x128xf32> to vector<32x128xf32>
    %102 = vector.shape_cast %99 : vector<32x128xf32> to vector<1x32x128xf32>
    tpu.vector_store %arg8[%c1_115, %c0_116, %c0_117], %102 {strides = array<i32>} : memref<2x32x128xf32, #tpu.memory_space<vmem>>, vector<1x32x128xf32>,
    return
  }
  func.func @transform_0(%arg0: i32) -> (i32, i32, i32) {
    %c0_i32 = arith.constant 0 : i32
    %c0_i32_0 = arith.constant 0 : i32
    %c0_i32_1 = arith.constant 0 : i32
    return %arg0, %c0_i32, %c0_i32_0 : i32, i32, i32
  }
  func.func @transform_1(%arg0: i32) -> (i32, i32, i32) {
    %c0_i32 = arith.constant 0 : i32
    %c0_i32_0 = arith.constant 0 : i32
    %c0_i32_1 = arith.constant 0 : i32
    return %arg0, %c0_i32, %c0_i32_0 : i32, i32, i32
  }
  func.func @transform_2(%arg0: i32) -> (i32, i32, i32) {
    %c0_i32 = arith.constant 0 : i32
    %c0_i32_0 = arith.constant 0 : i32
    %c0_i32_1 = arith.constant 0 : i32
    %c0_i32_2 = arith.constant 0 : i32
    return %c0_i32, %c0_i32_0, %c0_i32_1 : i32, i32, i32
  }
  func.func @transform_3(%arg0: i32) -> (i32, i32, i32) {
    %c0_i32 = arith.constant 0 : i32
    %c0_i32_0 = arith.constant 0 : i32
    %c0_i32_1 = arith.constant 0 : i32
    %c0_i32_2 = arith.constant 0 : i32
    return %c0_i32, %c0_i32_0, %c0_i32_1 : i32, i32, i32
  }
  func.func @transform_4(%arg0: i32) -> (i32, i32) {
    %c0_i32 = arith.constant 0 : i32
    %c0_i32_0 = arith.constant 0 : i32
    %c0_i32_1 = arith.constant 0 : i32
    return %c0_i32, %c0_i32_0 : i32, i32
  }
  func.func @transform_5(%arg0: i32) -> (i32, i32, i32) {
    %c0_i32 = arith.constant 0 : i32
    %c0_i32_0 = arith.constant 0 : i32
    %c0_i32_1 = arith.constant 0 : i32
    %c0_i32_2 = arith.constant 0 : i32
    return %c0_i32, %c0_i32_0, %c0_i32_1 : i32, i32, i32
  }
  func.func @transform_6(%arg0: i32) -> (i32, i32) {
    %c0_i32 = arith.constant 0 : i32
    %c0_i32_0 = arith.constant 0 : i32
    %c0_i32_1 = arith.constant 0 : i32
    return %c0_i32, %c0_i32_0 : i32, i32
  }
  func.func @transform_7(%arg0: i32) -> (i32, i32, i32) {
    %c0_i32 = arith.constant 0 : i32
    %c0_i32_0 = arith.constant 0 : i32
    %c0_i32_1 = arith.constant 0 : i32
    return %arg0, %c0_i32, %c0_i32_0 : i32, i32, i32
  }
}

</mosaic_0001>

<bundles_post_ra>
// kernel: tile.18
= control target key start
LH: loop header
LB: loop body
LE: loop exit
PB: predicated region body
PF: predicated region fallthrough
CT: control target
= control target key end

     0   :  { %s40_s0 = inlined_call_operand.vmem [shape: f32[4], index: 0, kind: input, shape index: {}]   ;;  %s41_s1 = inlined_call_operand.vmem [shape: f32[32,4], index: 1, kind: output, shape index: {}]  }
   0x1   :  { %v4_v0 = vld [vmem:[%s40_s0] ss:$0 sm:$0xff] }
   0x2   :  { %5 = vst [vmem:[%s41_s1] sm:$0xff] %v4_v0  ;;  %12 = vst [vmem:[%s41_s1 + $0x8] sm:$0xff] %v4_v0 }
   0x3   :  { %13 = vst [vmem:[%s41_s1 + $0x10] sm:$0xff] %v4_v0  ;;  %14 = vst [vmem:[%s41_s1 + $0x18] sm:$0xff] %v4_v0 }

// kernel: tile.19
= control target key start
LH: loop header
LB: loop body
LE: loop exit
PB: predicated region body
PF: predicated region fallthrough
CT: control target
= control target key end

     0   :  { %s261_s10 = smov 124   ;;  %s262_s11 = smov 116   ;;  %vm3_vm0 = vcmask 31744   ;;  %vm9_vm1 = vcmask 1048544   ;;  %vm15_vm2 = vcmask 1015744   ;;  %vm21_vm3 = vcmask 982944   ;;  %s401_s0 = inlined_call_operand.vmem [shape: f32[32,4], index: 0, kind: input, shape index: {}]   ;;  %s402_s1 = inlined_call_operand.vmem [shape: f32[1,128], index: 1, kind: output, shape index: {}]  }
   0x1   :  { %v199_v0 = vld [vmem:[%s401_s0 + $0x1f] sm:$0x1]   ;;  %v201_v1 = vld [vmem:[%s401_s0 + $0x1d] sm:$0x1]   ;;  %v200_v2 = vld [vmem:[%s401_s0 + $0x1e] sm:$0x1]  }
   0x2   :  { %7 = vrot.lane.b32.xlu0 %v199_v0, %s261_s10  ;;  %19 = vrot.lane.b32.xlu1 %v201_v1, %s262_s11  ;;  %v202_v3 = vld [vmem:[%s401_s0 + $0x1c] sm:$0x1]   ;;  %s263_s16 = smov 120   ;;  %s264_s17 = smov 112   ;;  %v203_v4 = vld [vmem:[%s401_s0 + $0x1b] sm:$0x1]  }
   0x3   :  { %v204_v5 = vld [vmem:[%s401_s0 + $0x1a] sm:$0x1]   ;;  %s265_s22 = smov 108   ;;  %s266_s23 = smov 104   ;;  %v205_v6 = vld [vmem:[%s401_s0 + $0x19] sm:$0x1]  }
   0x4   :  { %v206_v7 = vld [vmem:[%s401_s0 + $0x18] sm:$0x1]   ;;  %s267_s28 = smov 100   ;;  %s268_s29 = smov 96   ;;  %v207_v8 = vld [vmem:[%s401_s0 + $0x17] sm:$0x1]  }
   0x5   :  { %v208_v9 = vld [vmem:[%s401_s0 + $0x16] sm:$0x1]   ;;  %v2_v10 = vld [vmem:[%s401_s0] sm:$0x1]   ;;  %s269_s7 = smov 92   ;;  %s270_s8 = smov 88  }
   0x6   :  { %13 = vrot.lane.b32.xlu0 %v200_v2, %s263_s16  ;;  %25 = vrot.lane.b32.xlu1 %v202_v3, %s264_s17  ;;  %4 = vst.msk [vmem:[#allocation0] sm:$0x1] %vm3_vm0, %v2_v10   ;;  %v209_v11 = vld [vmem:[%s401_s0 + $0x15] sm:$0x1]   ;;  %v210_v12 = vld [vmem:[%s401_s0 + $0x14] sm:$0x1]  }
   0x7   :  { %s271_s13 = smov 84   ;;  %s272_s14 = smov 80   ;;  %v211_v13 = vld [vmem:[%s401_s0 + $0x13] sm:$0x1]   ;;  %v212_v14 = vld [vmem:[%s401_s0 + $0x12] sm:$0x1]  }
   0x8   :  { %s273_s19 = smov 76   ;;  %s274_s20 = smov 72   ;;  %v213_v15 = vld [vmem:[%s401_s0 + $0x11] sm:$0x1]   ;;  %v214_v16 = vld [vmem:[%s401_s0 + $0x10] sm:$0x1]  }
   0x9   :  { %s275_s25 = smov 68   ;;  %s276_s26 = smov 64   ;;  %v215_v17 = vld [vmem:[%s401_s0 + $0xf] sm:$0x1]   ;;  %v216_v18 = vld [vmem:[%s401_s0 + $0xe] sm:$0x1]  }
   0xa   :  { %31 = vrot.lane.b32.xlu0 %v203_v4, %s265_s22  ;;  %37 = vrot.lane.b32.xlu1 %v204_v5, %s266_s23  ;;  %s277_s2 = smov 60   ;;  %s278_s3 = smov 56   ;;  %v217_v19 = vld [vmem:[%s401_s0 + $0xd] sm:$0x1]   ;;  %v218_v20 = vld [vmem:[%s401_s0 + $0xc] sm:$0x1]  }
   0xb   :  { %s280_s9 = smov 48   ;;  %v219_v21 = vld [vmem:[%s401_s0 + $0xb] sm:$0x1]   ;;  %v220_v22 = vld [vmem:[%s401_s0 + $0xa] sm:$0x1]   ;;  %s282_s15 = smov 40  }
   0xc   :  { %v221_v23 = vld [vmem:[%s401_s0 + $0x9] sm:$0x1]   ;;  %v222_v24 = vld [vmem:[%s401_s0 + $0x8] sm:$0x1]   ;;  %s284_s21 = smov 32   ;;  %s286_s27 = smov 24  }
   0xd   :  { %v223_v25 = vld [vmem:[%s401_s0 + $0x7] sm:$0x1]   ;;  %v224_v26 = vld [vmem:[%s401_s0 + $0x6] sm:$0x1]   ;;  %v225_v27 = vld [vmem:[%s401_s0 + $0x5] sm:$0x1]  }
   0xe   :  { %43 = vrot.lane.b32.xlu0 %v205_v6, %s267_s28  ;;  %49 = vrot.lane.b32.xlu1 %v206_v7, %s268_s29  ;;  %v226_v28 = vld [vmem:[%s401_s0 + $0x4] sm:$0x1]   ;;  %s288_s4 = smov 16   ;;  %v227_v29 = vld [vmem:[%s401_s0 + $0x3] sm:$0x1]   ;;  %s290_s10 = smov 8  }
   0xf   :  { %v228_v30 = vld [vmem:[%s401_s0 + $0x2] sm:$0x1]   ;;  %v229_v31 = vld [vmem:[%s401_s0 + $0x1] sm:$0x1]   ;;  %s291_s0 = smov 4   ;;  %vm27_vm4 = vcmask 950144  }
  0x10   :  { %vm33_vm5 = vcmask 917344   ;;  %vm39_vm6 = vcmask 884544   ;;  %vm45_vm7 = vcmask 851744   ;;  %vm51_vm8 = vcmask 818944  }
  0x11   :  { %vm57_vm9 = vcmask 786144   ;;  %vm63_vm10 = vcmask 753344   ;;  %vm69_vm11 = vcmask 720544   ;;  %vm75_vm12 = vcmask 687744  }
  0x12   :  { %55 = vrot.lane.b32.xlu0 %v207_v8, %s269_s7  ;;  %61 = vrot.lane.b32.xlu1 %v208_v9, %s270_s8  ;;  %s279_s8 = smov 52   ;;  %vm81_vm13 = vcmask 654944   ;;  %vm87_vm14 = vcmask 622144   ;;  %vm93_vm15 = vcmask 589344   ;;  %vm99_vm0 = vcmask 556544  }
  0x16   :  { %67 = vrot.lane.b32.xlu0 %v209_v11, %s271_s13  ;;  %73 = vrot.lane.b32.xlu1 %v210_v12, %s272_s14  ;;  %s281_s14 = smov 44  }
  0x1a   :  { %79 = vrot.lane.b32.xlu0 %v211_v13, %s273_s19  ;;  %85 = vrot.lane.b32.xlu1 %v212_v14, %s274_s20  ;;  %s283_s20 = smov 36  }
  0x1e   :  { %91 = vrot.lane.b32.xlu0 %v213_v15, %s275_s25  ;;  %97 = vrot.lane.b32.xlu1 %v214_v16, %s276_s26  ;;  %s285_s26 = smov 28  }
  0x22   :  { %103 = vrot.lane.b32.xlu0 %v215_v17, %s277_s2  ;;  %109 = vrot.lane.b32.xlu1 %v216_v18, %s278_s3  ;;  %s287_s3 = smov 20  }
  0x26   :  { %115 = vrot.lane.b32.xlu0 %v217_v19, %s279_s8  ;;  %121 = vrot.lane.b32.xlu1 %v218_v20, %s280_s9  ;;  %s289_s9 = smov 12  }
  0x2a   :  { %127 = vrot.lane.b32.xlu0 %v219_v21, %s281_s14  ;;  %133 = vrot.lane.b32.xlu1 %v220_v22, %s282_s15 }
  0x2e   :  { %139 = vrot.lane.b32.xlu0 %v221_v23, %s283_s20  ;;  %145 = vrot.lane.b32.xlu1 %v222_v24, %s284_s21 }
  0x32   :  { %151 = vrot.lane.b32.xlu0 %v223_v25, %s285_s26  ;;  %157 = vrot.lane.b32.xlu1 %v224_v26, %s286_s27 }
  0x36   :  { %163 = vrot.lane.b32.xlu0 %v225_v27, %s287_s3  ;;  %169 = vrot.lane.b32.xlu1 %v226_v28, %s288_s4 }
  0x3a   :  { %175 = vrot.lane.b32.xlu0 %v227_v29, %s289_s9  ;;  %181 = vrot.lane.b32.xlu1 %v228_v30, %s290_s10 }
  0x3e   :  { %187 = vrot.lane.b32.xlu0 %v229_v31, %s291_s0 }
  0x74   :  { %v8_v32 = vpop.permute.xlu0 %7   ;;  %v20_v33 = vpop.permute.xlu1 %19  }
  0x75   :  { %10 = vst.msk [vmem:[#allocation0] sm:$0x1] %vm9_vm1, %v8_v32   ;;  %vm105_vm1 = vcmask 523744  }
  0x78   :  { %v14_v34 = vpop.permute.xlu0 %13   ;;  %v26_v35 = vpop.permute.xlu1 %25  }
  0x79   :  { %16 = vst.msk [vmem:[#allocation0] sm:$0x1] %vm15_vm2, %v14_v34   ;;  %vm111_vm2 = vcmask 490944  }
  0x7a   :  { %22 = vst.msk [vmem:[#allocation0] sm:$0x1] %vm21_vm3, %v20_v33   ;;  %vm117_vm3 = vcmask 458144  }
  0x7b   :  { %28 = vst.msk [vmem:[#allocation0] sm:$0x1] %vm27_vm4, %v26_v35   ;;  %vm123_vm4 = vcmask 425344  }
  0x7c   :  { %v32_v36 = vpop.permute.xlu0 %31   ;;  %v38_v37 = vpop.permute.xlu1 %37  }
  0x7d   :  { %34 = vst.msk [vmem:[#allocation0] sm:$0x1] %vm33_vm5, %v32_v36   ;;  %vm129_vm5 = vcmask 392544  }
  0x7e   :  { %40 = vst.msk [vmem:[#allocation0] sm:$0x1] %vm39_vm6, %v38_v37   ;;  %vm135_vm6 = vcmask 359744  }
  0x80   :  { %v44_v38 = vpop.permute.xlu0 %43   ;;  %v50_v39 = vpop.permute.xlu1 %49  }
  0x81   :  { %46 = vst.msk [vmem:[#allocation0] sm:$0x1] %vm45_vm7, %v44_v38   ;;  %vm141_vm7 = vcmask 326944  }
  0x82   :  { %52 = vst.msk [vmem:[#allocation0] sm:$0x1] %vm51_vm8, %v50_v39   ;;  %vm147_vm8 = vcmask 294144  }
  0x84   :  { %v56_v40 = vpop.permute.xlu0 %55   ;;  %v62_v41 = vpop.permute.xlu1 %61  }
  0x85   :  { %58 = vst.msk [vmem:[#allocation0] sm:$0x1] %vm57_vm9, %v56_v40   ;;  %vm153_vm9 = vcmask 261344  }
  0x86   :  { %64 = vst.msk [vmem:[#allocation0] sm:$0x1] %vm63_vm10, %v62_v41   ;;  %vm159_vm10 = vcmask 228544  }
  0x88   :  { %v68_v42 = vpop.permute.xlu0 %67   ;;  %v74_v43 = vpop.permute.xlu1 %73  }
  0x89   :  { %70 = vst.msk [vmem:[#allocation0] sm:$0x1] %vm69_vm11, %v68_v42   ;;  %vm165_vm11 = vcmask 195744  }
  0x8a   :  { %76 = vst.msk [vmem:[#allocation0] sm:$0x1] %vm75_vm12, %v74_v43   ;;  %vm171_vm12 = vcmask 162944  }
  0x8c   :  { %v80_v44 = vpop.permute.xlu0 %79   ;;  %v86_v45 = vpop.permute.xlu1 %85  }
  0x8d   :  { %82 = vst.msk [vmem:[#allocation0] sm:$0x1] %vm81_vm13, %v80_v44   ;;  %vm177_vm13 = vcmask 130144  }
  0x8e   :  { %88 = vst.msk [vmem:[#allocation0] sm:$0x1] %vm87_vm14, %v86_v45   ;;  %vm183_vm14 = vcmask 97344  }
  0x90   :  { %v92_v46 = vpop.permute.xlu0 %91   ;;  %v98_v47 = vpop.permute.xlu1 %97  }
  0x91   :  { %94 = vst.msk [vmem:[#allocation0] sm:$0x1] %vm93_vm15, %v92_v46   ;;  %vm189_vm15 = vcmask 64544  }
  0x92   :  { %100 = vst.msk [vmem:[#allocation0] sm:$0x1] %vm99_vm0, %v98_v47  }
  0x94   :  { %v104_v48 = vpop.permute.xlu0 %103   ;;  %v110_v49 = vpop.permute.xlu1 %109  }
  0x95   :  { %106 = vst.msk [vmem:[#allocation0] sm:$0x1] %vm105_vm1, %v104_v48  }
  0x96   :  { %112 = vst.msk [vmem:[#allocation0] sm:$0x1] %vm111_vm2, %v110_v49  }
  0x98   :  { %v116_v50 = vpop.permute.xlu0 %115   ;;  %v122_v51 = vpop.permute.xlu1 %121  }
  0x99   :  { %118 = vst.msk [vmem:[#allocation0] sm:$0x1] %vm117_vm3, %v116_v50  }
  0x9a   :  { %124 = vst.msk [vmem:[#allocation0] sm:$0x1] %vm123_vm4, %v122_v51  }
  0x9c   :  { %v128_v52 = vpop.permute.xlu0 %127   ;;  %v134_v53 = vpop.permute.xlu1 %133  }
  0x9d   :  { %130 = vst.msk [vmem:[#allocation0] sm:$0x1] %vm129_vm5, %v128_v52  }
  0x9e   :  { %136 = vst.msk [vmem:[#allocation0] sm:$0x1] %vm135_vm6, %v134_v53  }
  0xa0   :  { %v140_v54 = vpop.permute.xlu0 %139   ;;  %v146_v55 = vpop.permute.xlu1 %145  }
  0xa1   :  { %142 = vst.msk [vmem:[#allocation0] sm:$0x1] %vm141_vm7, %v140_v54  }
  0xa2   :  { %148 = vst.msk [vmem:[#allocation0] sm:$0x1] %vm147_vm8, %v146_v55  }
  0xa4   :  { %v152_v56 = vpop.permute.xlu0 %151   ;;  %v158_v57 = vpop.permute.xlu1 %157  }
  0xa5   :  { %154 = vst.msk [vmem:[#allocation0] sm:$0x1] %vm153_vm9, %v152_v56  }
  0xa6   :  { %160 = vst.msk [vmem:[#allocation0] sm:$0x1] %vm159_vm10, %v158_v57  }
  0xa8   :  { %v164_v58 = vpop.permute.xlu0 %163   ;;  %v170_v59 = vpop.permute.xlu1 %169  }
  0xa9   :  { %166 = vst.msk [vmem:[#allocation0] sm:$0x1] %vm165_vm11, %v164_v58  }
  0xaa   :  { %172 = vst.msk [vmem:[#allocation0] sm:$0x1] %vm171_vm12, %v170_v59  }
  0xac   :  { %v176_v60 = vpop.permute.xlu0 %175   ;;  %v182_v61 = vpop.permute.xlu1 %181  }
  0xad   :  { %178 = vst.msk [vmem:[#allocation0] sm:$0x1] %vm177_vm13, %v176_v60  }
  0xae   :  { %184 = vst.msk [vmem:[#allocation0] sm:$0x1] %vm183_vm14, %v182_v61  }
  0xb0   :  { %v188_v62 = vpop.permute.xlu0 %187  }
  0xb1   :  { %190 = vst.msk [vmem:[#allocation0] sm:$0x1] %vm189_vm15, %v188_v62  }
  0xb8   :  { %v195_v63 = vld [vmem:[#allocation0] sm:$0x1] }
  0xb9   :  { %198 = vst [vmem:[%s402_s1] sm:$0x1] %v195_v63 }

// kernel: up_forward.1
= control target key start
LH: loop header
LB: loop body
LE: loop exit
PB: predicated region body
PF: predicated region fallthrough
CT: control target
= control target key end

     0   :  { %v2858_v0 = vmov 0.0   ;;  %vm2859_vm0 = vmmov 0   ;;  %vm27_vm1 = vcmask 1040384   ;;  %vm28_vm2 = vsmask.f32 256  ;;  %s3754_s3 = inlined_call_operand.vmem [shape: bf16[3,128,128], index: 3, kind: input, shape index: {}]   ;;  %s3755_s2 = inlined_call_operand.vmem [shape: bf16[3,128,128], index: 2, kind: input, shape index: {}]   ;;  %s3756_s1 = inlined_call_operand.vmem [shape: bf16[2,32,128], index: 1, kind: input, shape index: {}]   ;;  %s3757_s0 = inlined_call_operand.vmem [shape: bf16[2,32,128], index: 0, kind: input, shape index: {}]   ;;  %s3758_s5 = inlined_call_operand.vmem [shape: bf16[3,128,128], index: 5, kind: input, shape index: {}]   ;;  %s3759_s4 = inlined_call_operand.vmem [shape: f32[1,128], index: 4, kind: input, shape index: {}]   ;;  %s3760_s6 = inlined_call_operand.vmem [shape: f32[1,128], index: 6, kind: input, shape index: {}]   ;;  %s3761_s7 = inlined_call_operand.vmem [shape: f32[2,32,128], index: 7, kind: output, shape index: {}]  }
   0x1   :  { %2423 = vmatprep.subr.bf16.mxu0 %v2858_v0  ;;  %2459 = vmatprep.subr.bf16.mxu1 %v2858_v0  ;;  %v2765_v1 = vld [vmem:[%s3754_s3 + $0x38] sm:$0xff]   ;;  %v2767_v3 = vld [vmem:[%s3754_s3 + $0x30] sm:$0xff]   ;;  %v2769_v5 = vld [vmem:[%s3754_s3 + $0x28] sm:$0xff]   ;;  %vm79_vm3 = vcmask 1043456   ;;  %vm37_vm5 = vsmask.f32 4368 }
   0x2   :  { %v2766_v2 = vld [vmem:[%s3755_s2 + $0x38] sm:$0xff]   ;;  %2439 = vmatprep.mubr.msk.bf16.mxu0 %vm2859_vm0, %v2858_v0  ;;  %2475 = vmatprep.mubr.msk.bf16.mxu1 %vm2859_vm0, %v2858_v0  ;;  %v2768_v4 = vld [vmem:[%s3755_s2 + $0x30] sm:$0xff]   ;;  %v2770_v6 = vld [vmem:[%s3755_s2 + $0x28] sm:$0xff]   ;;  %vm80_vm6 = vsmask.f32 7938  ;;  %vm154_vm9 = vcmask 1041409  }
   0x3   :  { %2424 = vmatpush3.bf16.msra.mxu0 %v2765_v1  ;;  %2460 = vmatpush3.bf16.msra.mxu1 %v2766_v2  ;;  %v2771_v7 = vld [vmem:[%s3754_s3 + $0x20] sm:$0xff]   ;;  %v2773_v9 = vld [vmem:[%s3754_s3 + $0x18] sm:$0xff]   ;;  %vm2946_vm4 = vmand %vm27_vm1, %vm28_vm2  ;;  %vm155_vm10 = vsmask.f32 1280  ;;  %vm211_vm12 = vcmask 1043457  }
   0x4   :  { %2425 = vmatprep.subr.bf16.mxu0 %v2858_v0  ;;  %2461 = vmatprep.subr.bf16.mxu1 %v2858_v0  ;;  %v2772_v8 = vld [vmem:[%s3755_s2 + $0x20] sm:$0xff]   ;;  %v2774_v10 = vld [vmem:[%s3755_s2 + $0x18] sm:$0xff]   ;;  %v2775_v13 = vld [vmem:[%s3754_s3 + $0x10] sm:$0xff]   ;;  %vm212_vm13 = vsmask.f32 7942 }
   0x5   :  { %v95_v12 = vld [vmem:[#allocation3] sm:$0x1]  ;;  %v98_v15 = vld [vmem:[%s3756_s1] sm:$0xf]  ;;  %v2776_v22 = vld [vmem:[%s3755_s2 + $0x10] sm:$0xff]  }
   0x6   :  { %v96_v14 = vsel %vm2946_vm4, 0, %v95_v12  ;;  %v99_v16 = vld [vmem:[%s3756_s1 + $0x4] sm:$0xf]  ;;  %v103_v17 = vshrl.u32 %v98_v15, 16  ;;  %v106_v18 = vshll.u32 %v98_v15, 16  ;;  %v2777_v26 = vld [vmem:[%s3754_s3 + $0x8] sm:$0xff]   ;;  %vm2984_vm7 = vmor %vm28_vm2, %vm37_vm5 }
   0x7   :  { %2426 = vmatpush3.bf16.msra.mxu0 %v2767_v3  ;;  %2462 = vmatpush3.bf16.msra.mxu1 %v2768_v4  ;;  %97 = vst [vmem:[#allocation3] sm:$0x1] %v96_v14  ;;  %v111_v19 = vshrl.u32 %v99_v16, 16  ;;  %v114_v20 = vshll.u32 %v99_v16, 16  ;;  %v30_v21 = vld [vmem:[#allocation2] sm:$0x1]  ;;  %vm2992_vm8 = vmand %vm79_vm3, %vm80_vm6 }
   0x8   :  { %2427 = vmatprep.subr.bf16.mxu0 %v2858_v0  ;;  %2463 = vmatprep.subr.bf16.mxu1 %v2858_v0  ;;  %v31_v23 = vsel %vm2946_vm4, 0, %v30_v21  ;;  %v33_v24 = vld [vmem:[%s3757_s0] sm:$0xf]  ;;  %v34_v25 = vld [vmem:[%s3757_s0 + $0x4] sm:$0xf]  ;;  %v105_v27 = vrot.slane %v103_v17, 7  ;;  %vm3040_vm11 = vmand %vm154_vm9, %vm155_vm10 }
   0x9   :  { %v2977_v28 = vrot.slane %v111_v19, 7  ;;  %32 = vst [vmem:[#allocation2] sm:$0x1] %v31_v23  ;;  %v40_v29 = vshrl.u32 %v33_v24, 16  ;;  %v43_v30 = vshll.u32 %v33_v24, 16  ;;  %v2778_v31 = vld [vmem:[%s3755_s2 + $0x8] sm:$0xff]   ;;  %vm3083_vm14 = vmand %vm27_vm1, %vm80_vm6 }
   0xa   :  { %v48_v33 = vshrl.u32 %v34_v25, 16  ;;  %v51_v34 = vshll.u32 %v34_v25, 16  ;;  %v108_v35 = vor.u32 %v106_v18, %v105_v27  ;;  %v109_v36 = vrot.slane %v105_v27, 4  ;;  %v100_v44 = vld [vmem:[%s3756_s1 + $0x8] sm:$0xf]  ;;  %v2779_v47 = vld [vmem:[%s3754_s3] sm:$0xff]   ;;  %vm3101_vm1 = vmand %vm211_vm12, %vm212_vm13 }
   0xb   :  { %2428 = vmatpush3.bf16.msra.mxu0 %v2769_v5  ;;  %2464 = vmatpush3.bf16.msra.mxu1 %v2770_v6  ;;  %v116_v37 = vor.u32 %v114_v20, %v2977_v28  ;;  %v42_v38 = vrot.slane %v40_v29, 7  ;;  %v101_v45 = vld [vmem:[%s3756_s1 + $0xc] sm:$0xf]  ;;  %v118_v46 = vrot.slane %v2977_v28, 4  ;;  %v120_v50 = vshrl.u32 %v100_v44, 16  ;;  %v2780_v58 = vld [vmem:[%s3755_s2] sm:$0xff]   ;;  %vm3229_vm6 = vmand %vm154_vm9, %vm212_vm13 }
   0xc   :  { %2429 = vmatprep.subr.bf16.mxu0 %v2858_v0  ;;  %2465 = vmatprep.subr.bf16.mxu1 %v2858_v0  ;;  %v2996_v40 = vrot.slane %v48_v33, 7  ;;  %v123_v51 = vshll.u32 %v100_v44, 16  ;;  %v129_v52 = vshrl.u32 %v101_v45, 16  ;;  %v132_v54 = vshll.u32 %v101_v45, 16  ;;  %v35_v55 = vld [vmem:[%s3757_s0 + $0x8] sm:$0xf] }
   0xd   :  { %v117_v41 = vsel %vm2984_vm7, %v109_v36, %v116_v37  ;;  %v45_v42 = vor.u32 %v43_v30, %v42_v38  ;;  %v46_v43 = vrot.slane %v42_v38, 4  ;;  %v36_v56 = vld [vmem:[%s3757_s0 + $0xc] sm:$0xf]  ;;  %v122_v61 = vrot.slane %v120_v50, 7  ;;  %v148_v14 = vld [vmem:[#allocation3 + $0x10] sm:$0x1] }
   0xe   :  { %v142_v48 = vld [vmem:[#allocation3] sm:$0xf]  ;;  %145 = vst [vmem:[#allocation3 + $0x4] sm:$0xf] %v117_v41  ;;  %v53_v49 = vor.u32 %v51_v34, %v2996_v40  ;;  %v55_v57 = vrot.slane %v2996_v40, 4  ;;  %v131_v62 = vrot.slane %v129_v52, 7 }
   0xf   :  { %2430 = vmatpush3.bf16.msra.mxu0 %v2771_v7  ;;  %2466 = vmatpush3.bf16.msra.mxu1 %v2772_v8  ;;  %v143_v53 = vsel %vm2992_vm8, %v108_v35, %v142_v48  ;;  %v57_v63 = vshrl.u32 %v35_v55, 16  ;;  %v60_v2 = vshll.u32 %v35_v55, 16  ;;  %v66_v3 = vshrl.u32 %v36_v56, 16  ;;  %v229_v20 = vld [vmem:[#allocation3 + $0x10] sm:$0x2]  ;;  %v2785_v24 = vld [vmem:[%s3755_s2 + $0x78] sm:$0xff]  }
  0x10   :  { %2431 = vmatprep.subr.bf16.mxu0 %v2858_v0  ;;  %2467 = vmatprep.subr.bf16.mxu1 %v2858_v0  ;;  %144 = vst [vmem:[#allocation3] sm:$0xf] %v143_v53  ;;  %v54_v59 = vsel %vm2984_vm7, %v46_v43, %v53_v49  ;;  %v82_v60 = vld [vmem:[#allocation2] sm:$0xf]  ;;  %v69_v4 = vshll.u32 %v36_v56, 16  ;;  %v125_v5 = vor.u32 %v123_v51, %v122_v61  ;;  %v127_v6 = vrot.slane %v122_v61, 4 }
  0x11   :  { %v83_v1 = vsel %vm2992_vm8, %v45_v42, %v82_v60  ;;  %85 = vst [vmem:[#allocation2 + $0x4] sm:$0xf] %v54_v59  ;;  %v134_v7 = vor.u32 %v132_v54, %v131_v62  ;;  %v136_v8 = vrot.slane %v131_v62, 4  ;;  %v2088_v30 = vld [vmem:[%s3756_s1 + $0x10] sm:$0xf]  ;;  %v2786_v33 = vld [vmem:[%s3754_s3 + $0x78] sm:$0xff]  }
  0x12   :  { %84 = vst [vmem:[#allocation2] sm:$0xf] %v83_v1  ;;  %v126_v12 = vsel %vm2984_vm7, %v118_v46, %v125_v5  ;;  %v2089_v34 = vld [vmem:[%s3756_s1 + $0x14] sm:$0xf]  ;;  %v88_v37 = vld [vmem:[#allocation2 + $0x10] sm:$0x1] }
  0x13   :  { %2432 = vmatpush3.bf16.msra.mxu0 %v2773_v9  ;;  %2468 = vmatpush3.bf16.msra.mxu1 %v2774_v10  ;;  %v59_v9 = vrot.slane %v57_v63, 7  ;;  %v68_v10 = vrot.slane %v66_v3, 7  ;;  %146 = vst [vmem:[#allocation3 + $0x8] sm:$0xf] %v126_v12  ;;  %v149_v21 = vsel %vm2946_vm4, %v136_v8, %v148_v14  ;;  %v2787_v36 = vld [vmem:[%s3755_s2 + $0x70] sm:$0xff]   ;;  %v238_v40 = vshrl.u32 %v2088_v30, 16 }
  0x14   :  { %2433 = vmatprep.subr.bf16.mxu0 %v2858_v0  ;;  %2469 = vmatprep.subr.bf16.mxu1 %v2858_v0  ;;  %150 = vst [vmem:[#allocation3 + $0x10] sm:$0x1] %v149_v21  ;;  %v2790_v38 = vld [vmem:[%s3754_s3 + $0x70] sm:$0xff]   ;;  %v241_v41 = vshll.u32 %v2088_v30, 16  ;;  %v247_v42 = vshrl.u32 %v2089_v34, 16  ;;  %v250_v53 = vshll.u32 %v2089_v34, 16 }
  0x15   :  { %v3035_v15 = vld [vmem:[#allocation3 + $0x4] sm:$0xf]  ;;  %v62_v16 = vor.u32 %v60_v2, %v59_v9  ;;  %v64_v17 = vrot.slane %v59_v9, 4  ;;  %v71_v18 = vor.u32 %v69_v4, %v68_v10  ;;  %v73_v29 = vrot.slane %v68_v10, 4  ;;  %v157_v45 = vld [vmem:[#allocation2 + $0x10] sm:$0x2] }
  0x16   :  { %vm165_vm15 = vsmask.f32 5392  ;;  %v240_v48 = vrot.slane %v238_v40, 6  ;;  %v243_v49 = vrot.slane %v241_v41, 7  ;;  %v249_v52 = vrot.slane %v247_v42, 6  ;;  %v2792_v56 = vld [vmem:[%s3754_s3 + $0x68] sm:$0xff]  }
  0x17   :  { %2434 = vmatpush3.bf16.msra.mxu0 %v2775_v13  ;;  %2470 = vmatpush3.bf16.msra.mxu1 %v2776_v22  ;;  %v135_v13 = vsel %vm2984_vm7, %v127_v6, %v134_v7  ;;  %v230_v22 = vsel %vm3040_vm11, 0, %v229_v20  ;;  %v318_v23 = vld [vmem:[#allocation3] sm:$0xf]  ;;  %v63_v25 = vsel %vm2984_vm7, %v55_v57, %v62_v16  ;;  %v89_v44 = vsel %vm2946_vm4, %v73_v29, %v88_v37  ;;  %v2084_v61 = vld [vmem:[%s3757_s0 + $0x10] sm:$0xf]  ;;  %vm3123_vm2 = vmor %vm155_vm10, %vm165_vm15 }
  0x18   :  { %2435 = vmatprep.subr.bf16.mxu0 %v2858_v0  ;;  %2471 = vmatprep.subr.bf16.mxu1 %v2858_v0  ;;  %147 = vst [vmem:[#allocation3 + $0xc] sm:$0xf] %v135_v13  ;;  %231 = vst [vmem:[#allocation3 + $0x10] sm:$0x2] %v230_v22  ;;  %v3056_v27 = vcombine.low %v318_v23, %v3035_v15  ;;  %v3058_v28 = vld [vmem:[#allocation2 + $0x4] sm:$0xf] }
  0x19   :  { %86 = vst [vmem:[#allocation2 + $0x8] sm:$0xf] %v63_v25  ;;  %90 = vst [vmem:[#allocation2 + $0x10] sm:$0x1] %v89_v44  ;;  %v252_v59 = vrot.slane %v250_v53, 7  ;;  %v158_v60 = vsel %vm3040_vm11, 0, %v157_v45 }
  0x1a   :  { %v2085_v62 = vld [vmem:[%s3757_s0 + $0x14] sm:$0xf]  ;;  %159 = vst [vmem:[#allocation2 + $0x10] sm:$0x2] %v158_v60  ;;  %v168_v3 = vshrl.u32 %v2084_v61, 16  ;;  %v171_v4 = vshll.u32 %v2084_v61, 16 }
  0x1b   :  { %2436 = vmatpush3.bf16.msra.mxu0 %v2777_v26  ;;  %2472 = vmatpush3.bf16.msra.mxu1 %v2778_v31  ;;  %v72_v26 = vsel %vm2984_vm7, %v64_v17, %v71_v18  ;;  %v293_v31 = vld [vmem:[#allocation2] sm:$0xf]  ;;  %v151_v50 = vld [vmem:[#allocation3 + $0x10] sm:$0x1]  ;;  %v3134_v6 = vor.u32 %v252_v59, %v249_v52  ;;  %v177_v7 = vshrl.u32 %v2085_v62, 16  ;;  %v180_v8 = vshll.u32 %v2085_v62, 16 }
  0x1c   :  { %2437 = vmatprep.subr.bf16.mxu0 %v2858_v0  ;;  %2473 = vmatprep.subr.bf16.mxu1 %v2858_v0  ;;  %87 = vst [vmem:[#allocation2 + $0xc] sm:$0xf] %v72_v26  ;;  %v3071_v35 = vcombine.low %v293_v31, %v3058_v28  ;;  %v152_v57 = vsel %vm3083_vm14, 0, %v151_v50  ;;  %v2795_v5 = vld [vmem:[%s3755_s2 + $0x60] sm:$0xff]   ;;  %vm220_vm3 = vcmask 1041408   ;;  %v170_v9 = vrot.slane %v168_v3, 6 }
  0x1d   :  { %153 = vst [vmem:[#allocation3 + $0x10] sm:$0x1] %v152_v57  ;;  %v173_v10 = vrot.slane %v171_v4, 7  ;;  %v2796_v12 = vld [vmem:[%s3754_s3 + $0x60] sm:$0xff]   ;;  %v179_v16 = vrot.slane %v177_v7, 6  ;;  %v182_v17 = vrot.slane %v180_v8, 7  ;;  %vm3192_vm5 = vmand %vm220_vm3, %vm155_vm10 }
  0x1e   :  { %v2797_v21 = vld [vmem:[%s3755_s2 + $0x58] sm:$0xff]   ;;  %v255_v22 = vrot.slane %v3134_v6, 4  ;;  %v2801_v51 = vld [vmem:[%s3755_s2 + $0x50] sm:$0xff]   ;;  %v2803_v4 = vld [vmem:[%s3755_s2 + $0x48] sm:$0xff]   ;;  %vm660_vm9 = vsmask.f32 7424 }
  0x1f   :  { %2438 = vmatpush3.bf16.msra.mxu0 %v2779_v47  ;;  %2474 = vmatpush3.bf16.msra.mxu1 %v2780_v58  ;;  %v3093_v46 = vld [vmem:[#allocation3 + $0x8] sm:$0xff]   ;;  %v281_v54 = vld [vmem:[#allocation3 + $0x10] sm:$0xe]  ;;  %v244_v58 = vor.u32 %v243_v49, %v240_v48  ;;  %v174_v20 = vor.u32 %v173_v10, %v170_v9  ;;  %v183_v23 = vor.u32 %v182_v17, %v179_v16  ;;  %v2091_v25 = vld [vmem:[%s3756_s1 + $0x1c] sm:$0xf]  ;;  %vm1049_vm10 = vcmask 1046528  }
  0x20   :  { %2495 = vmatprep.subr.bf16.mxu0 %v2858_v0  ;;  %2531 = vmatprep.subr.bf16.mxu1 %v2858_v0  ;;  %v2791_v47 = vld [vmem:[%s3755_s2 + $0x68] sm:$0xff]   ;;  %v92_v14 = vld [vmem:[#allocation2 + $0x10] sm:$0x1]  ;;  %v2086_v26 = vld [vmem:[%s3757_s0 + $0x18] sm:$0xf]  ;;  %v267_v34 = vshrl.u32 %v2091_v25, 16 }
  0x21   :  { %v245_v1 = vrot.slane %v244_v58, 4  ;;  %v282_v2 = vsel %vm3101_vm1, %v244_v58, %v281_v54  ;;  %v93_v18 = vsel %vm3083_vm14, 0, %v92_v14  ;;  %v175_v29 = vrot.slane %v174_v20, 4  ;;  %v2798_v30 = vld [vmem:[%s3754_s3 + $0x58] sm:$0xff]   ;;  %v214_v37 = vld [vmem:[#allocation2 + $0x10] sm:$0xe] }
  0x22   :  { %2440 = vmatmul.mubr.bf16.vlgmr.msra.gmra.mxu0 %v3056_v27  ;;  %2476 = vmatmul.mubr.bf16.vlgmr.msra.gmra.mxu1 %v3071_v35  ;;  %283 = vst [vmem:[#allocation3 + $0x10] sm:$0xe] %v282_v2  ;;  %94 = vst [vmem:[#allocation2 + $0x10] sm:$0x1] %v93_v18  ;;  %v185_v40 = vrot.slane %v183_v23, 4  ;;  %v187_v41 = vshrl.u32 %v2086_v26, 16  ;;  %v215_v45 = vsel %vm3101_vm1, %v174_v20, %v214_v37 }
  0x23   :  { %2496 = vmatpush3.bf16.msra.mxu0 %v2785_v24  ;;  %2443 = vmatprep.mubr.msk.bf16.mxu0 %vm2859_vm0, %v2858_v0  ;;  %v3105_v55 = vld [vmem:[#allocation2 + $0x8] sm:$0xff]   ;;  %v254_v13 = vsel %vm3123_vm2, %v245_v1, %v3134_v6  ;;  %v2090_v24 = vld [vmem:[%s3756_s1 + $0x18] sm:$0xf]  ;;  %v190_v42 = vshll.u32 %v2086_v26, 16  ;;  %v184_v44 = vsel %vm3123_vm2, %v175_v29, %v183_v23  ;;  %216 = vst [vmem:[#allocation2 + $0x10] sm:$0xe] %v215_v45 }
  0x24   :  { %2497 = vmatprep.subr.bf16.mxu0 %v2858_v0  ;;  %2532 = vmatpush3.bf16.msra.mxu1 %v2786_v33  ;;  %284 = vst [vmem:[#allocation3 + $0x14] sm:$0xf] %v254_v13  ;;  %v257_v31 = vshrl.u32 %v2090_v24, 16  ;;  %v260_v33 = vshll.u32 %v2090_v24, 16  ;;  %217 = vst [vmem:[#allocation2 + $0x14] sm:$0xf] %v184_v44 }
  0x25   :  { %2479 = vmatprep.mubr.msk.bf16.mxu1 %vm2859_vm0, %v2858_v0  ;;  %2533 = vmatprep.subr.bf16.mxu1 %v2858_v0  ;;  %v269_v49 = vrot.slane %v267_v34, 6  ;;  %v189_v52 = vrot.slane %v187_v41, 6  ;;  %v192_v53 = vrot.slane %v190_v42, 7  ;;  %v2802_v58 = vld [vmem:[%s3754_s3 + $0x50] sm:$0xff]   ;;  %v287_v9 = vld [vmem:[#allocation3 + $0x20] sm:$0x3] }
  0x26   :  { %v262_v48 = vrot.slane %v260_v33, 7  ;;  %v222_v13 = vld [vmem:[#allocation2 + $0x20] sm:$0x3]  ;;  %v2806_v16 = vld [vmem:[%s3754_s3 + $0x48] sm:$0xff]   ;;  %v1193_v34 = vld [vmem:[#allocation3] sm:$0xe] }
  0x27   :  { %2498 = vmatpush3.bf16.msra.mxu0 %v2787_v36  ;;  %v2087_v36 = vld [vmem:[%s3757_s0 + $0x1c] sm:$0xf]  ;;  %v193_v61 = vor.u32 %v192_v53, %v189_v52  ;;  %v2808_v63 = vld [vmem:[%s3754_s3 + $0x40] sm:$0xff]   ;;  %v669_v44 = vshll.u32 %v3105_v55, 16  ;;  %v856_v45 = vshrl.u32 %v3056_v27, 16  ;;  %v2848_v43 = vld [vmem:[%s3758_s5 + $0xa8] sm:$0xff]  }
  0x28   :  { %2499 = vmatprep.subr.bf16.mxu0 %v2858_v0  ;;  %2534 = vmatpush3.bf16.msra.mxu1 %v2790_v38  ;;  %v270_v38 = vshll.u32 %v2091_v25, 16  ;;  %v200_v57 = vshll.u32 %v2087_v36, 16  ;;  %v1028_v42 = vld [vmem:[#allocation2] sm:$0xe] }
  0x29   :  { %2535 = vmatprep.subr.bf16.mxu1 %v2858_v0  ;;  %v194_v6 = vsel %vm3123_vm2, %v185_v40, %v193_v61  ;;  %v195_v7 = vrot.slane %v193_v61, 4  ;;  %v671_v52 = vrot.slane %v669_v44, 1  ;;  %v867_v61 = vshrl.u32 %v3093_v46, 16  ;;  %v2855_v23 = vld [vmem:[%s3758_s5 + $0x80] sm:$0xff]  }
  0x2a   :  { %2444 = vmatmul.mubr.bf16.gmra.mxu0 %v3093_v46  ;;  %2480 = vmatmul.mubr.bf16.gmra.mxu1 %v3105_v55  ;;  %v272_v50 = vrot.slane %v270_v38, 7  ;;  %v202_v3 = vrot.slane %v200_v57, 7  ;;  %218 = vst [vmem:[#allocation2 + $0x18] sm:$0xf] %v194_v6  ;;  %v662_v38 = vshrl.u32 %v3071_v35, 16  ;;  %v2809_v57 = vld [vmem:[%s3755_s2 + $0xb8] sm:$0xff]  }
  0x2b   :  { %2500 = vmatpush3.bf16.msra.mxu0 %v2791_v47  ;;  %2447 = vmatprep.mubr.msk.bf16.mxu0 %vm2859_vm0, %v2858_v0  ;;  %v259_v47 = vrot.slane %v257_v31, 6  ;;  %v3182_v59 = vld [vmem:[#allocation3 + $0x10] sm:$0xff]   ;;  %v664_v31 = vshll.u32 %v3071_v35, 16  ;;  %v2184_v35 = vcombine.low %v1028_v42, %v3058_v28  ;;  %v1215_v6 = vrot.slane %v3093_v46, 1 }
  0x2c   :  { %2501 = vmatprep.subr.bf16.mxu0 %v2858_v0  ;;  %2536 = vmatpush3.bf16.msra.mxu1 %v2792_v56  ;;  %v197_v56 = vshrl.u32 %v2087_v36, 16  ;;  %v273_v60 = vor.u32 %v272_v50, %v269_v49  ;;  %v3210_v17 = vld [vmem:[#allocation2 + $0x10] sm:$0xff]   ;;  %v2209_v49 = vcombine.low %v1193_v34, %v3035_v15 }
  0x2d   :  { %2483 = vmatprep.mubr.msk.bf16.mxu1 %vm2859_vm0, %v2858_v0  ;;  %2537 = vmatprep.subr.bf16.mxu1 %v2858_v0  ;;  %v263_v54 = vor.u32 %v262_v48, %v259_v47  ;;  %v666_v41 = vrot.slane %v664_v31, 1  ;;  %v863_v48 = vshll.u32 %v3093_v46, 16  ;;  %v1050_v28 = vrot.slane %v2184_v35, 1  ;;  %v2814_v31 = vld [vmem:[%s3754_s3 + $0xa8] sm:$0xff]  }
  0x2e   :  { %v199_v2 = vrot.slane %v197_v56, 6  ;;  %v275_v8 = vrot.slane %v273_v60, 4  ;;  %v673_v56 = vshrl.u32 %v3105_v55, 16 }
  0x2f   :  { %2502 = vmatpush3.bf16.msra.mxu0 %v2795_v5  ;;  %v264_v62 = vsel %vm3123_vm2, %v255_v22, %v263_v54  ;;  %v265_v1 = vrot.slane %v263_v54, 4  ;;  %v2807_v22 = vld [vmem:[%s3755_s2 + $0x40] sm:$0xff]   ;;  %v667_v50 = vor.u32 %v666_v41, %v662_v38  ;;  %v1214_v54 = vrot.slane %v2209_v49, 1 }
  0x30   :  { %2503 = vmatprep.subr.bf16.mxu0 %v2858_v0  ;;  %2538 = vmatpush3.bf16.msra.mxu1 %v2796_v12  ;;  %285 = vst [vmem:[#allocation3 + $0x18] sm:$0xf] %v264_v62  ;;  %v203_v12 = vor.u32 %v202_v3, %v199_v2  ;;  %v288_v14 = vsel %vm3192_vm5, %v275_v8, %v287_v9  ;;  %v871_v62 = vshll.u32 %v3182_v59, 16  ;;  %v2811_v2 = vld [vmem:[%s3755_s2 + $0xb0] sm:$0xff]   ;;  %v2816_v41 = vld [vmem:[%s3754_s3 + $0xa0] sm:$0xff]  }
  0x31   :  { %2539 = vmatprep.subr.bf16.mxu1 %v2858_v0  ;;  %v274_v10 = vsel %vm3123_vm2, %v265_v1, %v273_v60  ;;  %289 = vst [vmem:[#allocation3 + $0x20] sm:$0x3] %v288_v14  ;;  %v672_v15 = vsel %vm660_vm9, %v667_v50, %v671_v52  ;;  %v1051_v1 = vrot.slane %v3105_v55, 1  ;;  %v675_v3 = vor.u32 %v673_v56, %v671_v52  ;;  %v2818_v50 = vld [vmem:[%s3754_s3 + $0x98] sm:$0xff]  }
  0x32   :  { %2448 = vmatmul.mubr.bf16.gmra.mxu0 %v3182_v59  ;;  %286 = vst [vmem:[#allocation3 + $0x1c] sm:$0xf] %v274_v10  ;;  %v204_v18 = vsel %vm3123_vm2, %v195_v7, %v203_v12  ;;  %v205_v20 = vrot.slane %v203_v12, 4  ;;  %2484 = vmatmul.mubr.bf16.gmra.mxu1 %v3210_v17  ;;  %v1053_v7 = vrot.slane %v3210_v17, 1  ;;  %v1217_v55 = vrot.slane %v3182_v59, 1 }
  0x33   :  { %2504 = vmatpush3.bf16.msra.mxu0 %v2797_v21  ;;  %2451 = vmatprep.mubr.msk.bf16.mxu0 %vm2859_vm0, %v2858_v0  ;;  %219 = vst [vmem:[#allocation2 + $0x1c] sm:$0xf] %v204_v18  ;;  %v3284_v8 = vsel %vm1049_vm10, %v1050_v28, %v1051_v1  ;;  %v873_v46 = vrot.slane %v871_v62, 1  ;;  %v3295_v14 = vsel %vm1049_vm10, %v1214_v54, %v1215_v6  ;;  %v2821_v54 = vld [vmem:[%s3755_s2 + $0x90] sm:$0xff]   ;;  %v2823_v28 = vld [vmem:[%s3755_s2 + $0x88] sm:$0xff]   ;;  %v2825_v62 = vld [vmem:[%s3755_s2 + $0x80] sm:$0xff]  }
  0x34   :  { %2505 = vmatprep.subr.bf16.mxu0 %v2858_v0  ;;  %2540 = vmatpush3.bf16.msra.mxu1 %v2798_v30  ;;  %v223_v21 = vsel %vm3192_vm5, %v205_v20, %v222_v13  ;;  %v858_v30 = vshll.u32 %v3056_v27, 16  ;;  %v865_v27 = vrot.slane %v863_v48, 1  ;;  %v2812_v13 = vld [vmem:[%s3754_s3 + $0xb0] sm:$0xff]   ;;  %v3302_v18 = vsel %vm1049_vm10, %v1215_v6, %v1217_v55 }
  0x35   :  { %2541 = vmatprep.subr.bf16.mxu1 %v2858_v0  ;;  %2487 = vmatprep.mubr.msk.bf16.mxu1 %vm2859_vm0, %v2858_v0  ;;  %224 = vst [vmem:[#allocation2 + $0x20] sm:$0x3] %v223_v21 }
  0x36   :  { %v860_v47 = vrot.slane %v858_v30, 1  ;;  %v869_v12 = vor.u32 %v867_v61, %v865_v27 }
  0x37   :  { %2506 = vmatpush3.bf16.msra.mxu0 %v2801_v51  ;;  %v677_v51 = vshll.u32 %v3210_v17, 16 }
  0x38   :  { %2507 = vmatprep.subr.bf16.mxu0 %v2858_v0  ;;  %2542 = vmatpush3.bf16.msra.mxu1 %v2802_v58  ;;  %v290_v25 = vld [vmem:[#allocation3 + $0x20] sm:$0x2]  ;;  %v2804_v36 = vld [vmem:[#allocation3 + $0x20] ss:$0 sps:$4 sm:$0x11]   ;;  %v861_v53 = vor.u32 %v860_v47, %v856_v45  ;;  %v2810_v58 = vld [vmem:[%s3754_s3 + $0xb8] sm:$0xff]   ;;  %v874_v30 = vsel %vm660_vm9, %v869_v12, %v873_v46 }
  0x39   :  { %2543 = vmatprep.subr.bf16.mxu1 %v2858_v0  ;;  %v3234_v24 = vld [vmem:[#allocation3 + $0x18] sm:$0xff]   ;;  %v291_v29 = vsel %vm3229_vm6, 0, %v290_v25  ;;  %v681_v25 = vshrl.u32 %v3210_v17, 16  ;;  %v3341_v42 = vld [vmem:[#allocation3 + $0x20] ss:$0 sps:$4 sm:$0x33]  }
  0x3a   :  { %2452 = vmatmul.mubr.bf16.gmra.mxu0 %v3234_v24  ;;  %v3238_v26 = vld [vmem:[#allocation2 + $0x18] sm:$0xff]   ;;  %292 = vst [vmem:[#allocation3 + $0x20] sm:$0x2] %v291_v29  ;;  %v866_v60 = vsel %vm660_vm9, %v861_v53, %v865_v27  ;;  %v1219_v10 = vrot.slane %v3234_v24, 1  ;;  %v879_v34 = vshll.u32 %v3234_v24, 16  ;;  %v883_v52 = vshrl.u32 %v3234_v24, 16 }
  0x3b   :  { %2508 = vmatpush3.bf16.msra.mxu0 %v2803_v4  ;;  %2455 = vmatprep.mubr.msk.bf16.mxu0 %vm2859_vm0, %v2858_v0  ;;  %v679_v4 = vrot.slane %v677_v51, 1  ;;  %v1055_v9 = vrot.slane %v3238_v26, 1  ;;  %v685_v29 = vshll.u32 %v3238_v26, 16  ;;  %v2817_v45 = vld [vmem:[%s3755_s2 + $0x98] sm:$0xff]   ;;  %v689_v47 = vshrl.u32 %v3238_v26, 16  ;;  %v2831_v12 = vld [vmem:[%s3758_s5 + $0x70] sm:$0xff]  }
  0x3c   :  { %2509 = vmatprep.subr.bf16.mxu0 %v2858_v0  ;;  %2544 = vmatpush3.bf16.msra.mxu1 %v2806_v16  ;;  %v226_v33 = vld [vmem:[#allocation2 + $0x20] sm:$0x2]  ;;  %v2805_v40 = vld [vmem:[#allocation2 + $0x20] ss:$0 sps:$4 sm:$0x11]   ;;  %v3298_v16 = vsel %vm1049_vm10, %v1051_v1, %v1053_v7  ;;  %v3312_v21 = vsel %vm1049_vm10, %v1217_v55, %v1219_v10  ;;  %v887_v35 = vshll.u32 %v3341_v42, 16 }
  0x3d   :  { %2545 = vmatprep.subr.bf16.mxu1 %v2858_v0  ;;  %2488 = vmatmul.mubr.bf16.gmra.mxu1 %v3238_v26  ;;  %v227_v37 = vsel %vm3229_vm6, 0, %v226_v33  ;;  %v3307_v20 = vsel %vm1049_vm10, %v1053_v7, %v1055_v9  ;;  %v875_v33 = vshrl.u32 %v3182_v59, 16  ;;  %v683_v17 = vor.u32 %v681_v25, %v679_v4  ;;  %v3333_v38 = vld [vmem:[#allocation2 + $0x20] ss:$0 sps:$4 sm:$0x33]   ;;  %v2827_v24 = vld [vmem:[%s3758_s5 + $0x38] sm:$0xff]  }
  0x3e   :  { %2491 = vmatprep.mubr.msk.bf16.mxu1 %vm2859_vm0, %v2858_v0  ;;  %228 = vst [vmem:[#allocation2 + $0x20] sm:$0x2] %v227_v37  ;;  %v2815_v37 = vld [vmem:[%s3755_s2 + $0xa0] sm:$0xff]   ;;  %v693_v48 = vshll.u32 %v3333_v38, 16  ;;  %v697_v61 = vshrl.u32 %v3333_v38, 16  ;;  %v891_v1 = vshrl.u32 %v3341_v42, 16 }
  0x3f   :  { %2510 = vmatpush3.bf16.msra.mxu0 %v2807_v22  ;;  %v680_v22 = vsel %vm660_vm9, %v675_v3, %v679_v4  ;;  %v877_v59 = vor.u32 %v875_v33, %v873_v46  ;;  %v1057_v6 = vrot.slane %v3333_v38, 1  ;;  %v1221_v7 = vrot.slane %v3341_v42, 1  ;;  %v2828_v26 = vld [vmem:[%s3758_s5 + $0x30] sm:$0xff]   ;;  %v2832_v46 = vld [vmem:[%s3758_s5 + $0x20] sm:$0xff]   ;;  %v2842_v25 = vld [vmem:[%s3758_s5 + $0x48] sm:$0xff]  }
  0x40   :  { %2567 = vmatprep.subr.bf16.mxu0 %v2858_v0  ;;  %2546 = vmatpush3.bf16.msra.mxu1 %v2808_v63  ;;  %v2813_v63 = vld [vmem:[%s3755_s2 + $0xa8] sm:$0xff]   ;;  %v695_v27 = vrot.slane %v693_v48, 1 }
  0x41   :  { %2603 = vmatprep.subr.bf16.mxu1 %v2858_v0  ;;  %v1222_v55 = vsel %vm1049_vm10, %v1219_v10, %v1221_v7  ;;  %v2830_v10 = vld [vmem:[%s3758_s5 + $0x28] sm:$0xff]  }
  0x42   :  { %2456 = vmatmul.mubr.bf16.gmra.mxu0 %v2804_v36  ;;  %v687_v36 = vrot.slane %v685_v29, 1  ;;  %v699_v3 = vor.u32 %v697_v61, %v695_v27 }
  0x43   :  { %2511 = vmatprep.mubr.msk.bf16.mxu0 %vm2859_vm0, %v2858_v0 }
  0x44   :  { %v688_v44 = vsel %vm660_vm9, %v683_v17, %v687_v36  ;;  %v691_v53 = vor.u32 %v689_v47, %v687_v36 }
  0x45   :  { %2492 = vmatmul.mubr.bf16.gmra.mxu1 %v2805_v40  ;;  %v881_v40 = vrot.slane %v879_v34, 1 }
  0x46   :  { %2547 = vmatprep.mubr.msk.bf16.mxu1 %vm2859_vm0, %v2858_v0  ;;  %v696_v51 = vsel %vm660_vm9, %v691_v53, %v695_v27 }
  0x47   :  { %v882_v49 = vsel %vm660_vm9, %v877_v59, %v881_v40  ;;  %v885_v56 = vor.u32 %v883_v52, %v881_v40 }
  0x4a   :  { %2512 = vmatmul.mubr.bf16.vlgmr.msra.gmra.mxu0 %v672_v15  ;;  %v889_v15 = vrot.slane %v887_v35, 1 }
  0x4b   :  { %2568 = vmatpush3.bf16.msra.mxu0 %v2809_v57  ;;  %2515 = vmatprep.mubr.msk.bf16.mxu0 %vm2859_vm0, %v2858_v0  ;;  %v2822_v57 = vld [vmem:[%s3754_s3 + $0x90] sm:$0xff]  }
  0x4c   :  { %2569 = vmatprep.subr.bf16.mxu0 %v2858_v0  ;;  %v893_v4 = vor.u32 %v891_v1, %v889_v15 }
  0x4d   :  { %2548 = vmatmul.mubr.bf16.vlgmr.msra.gmra.mxu1 %v866_v60  ;;  %v2824_v60 = vld [vmem:[%s3754_s3 + $0x88] sm:$0xff]  }
  0x4e   :  { %2604 = vmatpush3.bf16.msra.mxu1 %v2810_v58  ;;  %2551 = vmatprep.mubr.msk.bf16.mxu1 %vm2859_vm0, %v2858_v0  ;;  %v890_v58 = vsel %vm660_vm9, %v885_v56, %v889_v15 }
  0x4f   :  { %2605 = vmatprep.subr.bf16.mxu1 %v2858_v0  ;;  %2570 = vmatpush3.bf16.msra.mxu0 %v2811_v2  ;;  %v2826_v2 = vld [vmem:[%s3754_s3 + $0x80] sm:$0xff]  }
  0x50   :  { %2571 = vmatprep.subr.bf16.mxu0 %v2858_v0 }
  0x52   :  { %2606 = vmatpush3.bf16.msra.mxu1 %v2812_v13  ;;  %2516 = vmatmul.mubr.bf16.gmra.mxu0 %v680_v22  ;;  %v2833_v13 = vld [vmem:[%s3758_s5 + $0x68] sm:$0xff]   ;;  %v2839_v22 = vld [vmem:[%s3758_s5 + $0x50] sm:$0xff]  }
  0x53   :  { %2607 = vmatprep.subr.bf16.mxu1 %v2858_v0  ;;  %2572 = vmatpush3.bf16.msra.mxu0 %v2813_v63  ;;  %v2840_v63 = vld [vmem:[%s3758_s5] sm:$0xff]  }
  0x54   :  { %2519 = vmatprep.mubr.msk.bf16.mxu0 %vm2859_vm0, %v2858_v0  ;;  %2573 = vmatprep.subr.bf16.mxu0 %v2858_v0 }
  0x55   :  { %2552 = vmatmul.mubr.bf16.gmra.mxu1 %v874_v30  ;;  %v2843_v30 = vld [vmem:[%s3758_s5 + $0x40] sm:$0xff]  }
  0x56   :  { %2608 = vmatpush3.bf16.msra.mxu1 %v2814_v31  ;;  %2555 = vmatprep.mubr.msk.bf16.mxu1 %vm2859_vm0, %v2858_v0 }
  0x57   :  { %2609 = vmatprep.subr.bf16.mxu1 %v2858_v0  ;;  %2574 = vmatpush3.bf16.msra.mxu0 %v2815_v37 }
  0x58   :  { %2575 = vmatprep.subr.bf16.mxu0 %v2858_v0 }
  0x5a   :  { %2610 = vmatpush3.bf16.msra.mxu1 %v2816_v41  ;;  %2520 = vmatmul.mubr.bf16.gmra.mxu0 %v688_v44 }
  0x5b   :  { %2611 = vmatprep.subr.bf16.mxu1 %v2858_v0  ;;  %2576 = vmatpush3.bf16.msra.mxu0 %v2817_v45 }
  0x5c   :  { %2523 = vmatprep.mubr.msk.bf16.mxu0 %vm2859_vm0, %v2858_v0  ;;  %2577 = vmatprep.subr.bf16.mxu0 %v2858_v0 }
  0x5d   :  { %2556 = vmatmul.mubr.bf16.gmra.mxu1 %v882_v49 }
  0x5e   :  { %2559 = vmatprep.mubr.msk.bf16.mxu1 %vm2859_vm0, %v2858_v0  ;;  %2612 = vmatpush3.bf16.msra.mxu1 %v2818_v50 }
  0x5f   :  { %2613 = vmatprep.subr.bf16.mxu1 %v2858_v0  ;;  %2578 = vmatpush3.bf16.msra.mxu0 %v2821_v54 }
  0x60   :  { %2579 = vmatprep.subr.bf16.mxu0 %v2858_v0 }
  0x62   :  { %2614 = vmatpush3.bf16.msra.mxu1 %v2822_v57  ;;  %2524 = vmatmul.mubr.bf16.gmra.mxu0 %v696_v51 }
  0x63   :  { %2615 = vmatprep.subr.bf16.mxu1 %v2858_v0  ;;  %2527 = vmatprep.mubr.msk.bf16.mxu0 %vm2859_vm0, %v2858_v0 }
  0x64   :  { %2580 = vmatpush3.bf16.msra.mxu0 %v2823_v28 }
  0x65   :  { %2560 = vmatmul.mubr.bf16.gmra.mxu1 %v890_v58  ;;  %2581 = vmatprep.subr.bf16.mxu0 %v2858_v0 }
  0x66   :  { %2563 = vmatprep.mubr.msk.bf16.mxu1 %vm2859_vm0, %v2858_v0  ;;  %2616 = vmatpush3.bf16.msra.mxu1 %v2824_v60 }
  0x67   :  { %2617 = vmatprep.subr.bf16.mxu1 %v2858_v0 }
  0x68   :  { %2582 = vmatpush3.bf16.msra.mxu0 %v2825_v62 }
  0x69   :  { %2639 = vmatprep.subr.bf16.mxu0 %v2858_v0 }
  0x6a   :  { %2618 = vmatpush3.bf16.msra.mxu1 %v2826_v2  ;;  %2528 = vmatmul.mubr.bf16.gmra.mxu0 %v699_v3 }
  0x6b   :  { %2675 = vmatprep.subr.bf16.mxu1 %v2858_v0  ;;  %2583 = vmatprep.mubr.msk.bf16.mxu0 %vm2859_vm0, %v2858_v0 }
  0x6d   :  { %2564 = vmatmul.mubr.bf16.gmra.mxu1 %v893_v4 }
  0x6e   :  { %2619 = vmatprep.mubr.msk.bf16.mxu1 %vm2859_vm0, %v2858_v0 }
  0x72   :  { %2584 = vmatmul.mubr.bf16.vlgmr.msra.gmra.mxu0 %v3284_v8  ;;  %v1058_v8 = vsel %vm1049_vm10, %v1055_v9, %v1057_v6  ;;  %v2829_v9 = vld [vmem:[%s3758_s5 + $0x78] sm:$0xff]  }
  0x73   :  { %2587 = vmatprep.mubr.msk.bf16.mxu0 %vm2859_vm0, %v2858_v0  ;;  %2640 = vmatpush3.bf16.msra.mxu0 %v2829_v9 }
  0x74   :  { %2641 = vmatprep.subr.bf16.mxu0 %v2858_v0 }
  0x75   :  { %2620 = vmatmul.mubr.bf16.vlgmr.msra.gmra.mxu1 %v3295_v14  ;;  %v2834_v14 = vld [vmem:[%s3758_s5 + $0x18] sm:$0xff]  }
  0x76   :  { %2623 = vmatprep.mubr.msk.bf16.mxu1 %vm2859_vm0, %v2858_v0  ;;  %2676 = vmatpush3.bf16.msra.mxu1 %v2827_v24 }
  0x77   :  { %2677 = vmatprep.subr.bf16.mxu1 %v2858_v0  ;;  %2642 = vmatpush3.bf16.msra.mxu0 %v2831_v12 }
  0x78   :  { %2643 = vmatprep.subr.bf16.mxu0 %v2858_v0 }
  0x7a   :  { %2588 = vmatmul.mubr.bf16.gmra.mxu0 %v3298_v16  ;;  %2678 = vmatpush3.bf16.msra.mxu1 %v2828_v26  ;;  %v2835_v16 = vld [vmem:[%s3758_s5 + $0x60] sm:$0xff]  }
  0x7b   :  { %2591 = vmatprep.mubr.msk.bf16.mxu0 %vm2859_vm0, %v2858_v0  ;;  %2679 = vmatprep.subr.bf16.mxu1 %v2858_v0 }
  0x7c   :  { %2644 = vmatpush3.bf16.msra.mxu0 %v2833_v13 }
  0x7d   :  { %2624 = vmatmul.mubr.bf16.gmra.mxu1 %v3302_v18  ;;  %2645 = vmatprep.subr.bf16.mxu0 %v2858_v0  ;;  %v2836_v18 = vld [vmem:[%s3758_s5 + $0x10] sm:$0xff]  }
  0x7e   :  { %2627 = vmatprep.mubr.msk.bf16.mxu1 %vm2859_vm0, %v2858_v0  ;;  %2680 = vmatpush3.bf16.msra.mxu1 %v2830_v10 }
  0x7f   :  { %2681 = vmatprep.subr.bf16.mxu1 %v2858_v0 }
  0x80   :  { %2646 = vmatpush3.bf16.msra.mxu0 %v2835_v16 }
  0x81   :  { %2647 = vmatprep.subr.bf16.mxu0 %v2858_v0 }
  0x82   :  { %2592 = vmatmul.mubr.bf16.gmra.mxu0 %v3307_v20  ;;  %2682 = vmatpush3.bf16.msra.mxu1 %v2832_v46  ;;  %v2837_v20 = vld [vmem:[%s3758_s5 + $0x58] sm:$0xff]  }
  0x83   :  { %2595 = vmatprep.mubr.msk.bf16.mxu0 %vm2859_vm0, %v2858_v0  ;;  %2683 = vmatprep.subr.bf16.mxu1 %v2858_v0 }
  0x84   :  { %2648 = vmatpush3.bf16.msra.mxu0 %v2837_v20 }
  0x85   :  { %2628 = vmatmul.mubr.bf16.gmra.mxu1 %v3312_v21  ;;  %v2838_v21 = vld [vmem:[%s3758_s5 + $0x8] sm:$0xff]   ;;  %2649 = vmatprep.subr.bf16.mxu0 %v2858_v0 }
  0x86   :  { %2631 = vmatprep.mubr.msk.bf16.mxu1 %vm2859_vm0, %v2858_v0  ;;  %2684 = vmatpush3.bf16.msra.mxu1 %v2834_v14 }
  0x87   :  { %2685 = vmatprep.subr.bf16.mxu1 %v2858_v0 }
  0x88   :  { %2650 = vmatpush3.bf16.msra.mxu0 %v2839_v22 }
  0x89   :  { %2651 = vmatprep.subr.bf16.mxu0 %v2858_v0 }
  0x8a   :  { %2596 = vmatmul.mubr.bf16.gmra.mxu0 %v1058_v8  ;;  %2686 = vmatpush3.bf16.msra.mxu1 %v2836_v18 }
  0x8b   :  { %2599 = vmatprep.mubr.msk.bf16.mxu0 %vm2859_vm0, %v2858_v0  ;;  %2687 = vmatprep.subr.bf16.mxu1 %v2858_v0 }
  0x8c   :  { %2652 = vmatpush3.bf16.msra.mxu0 %v2842_v25 }
  0x8d   :  { %2632 = vmatmul.mubr.bf16.gmra.mxu1 %v1222_v55  ;;  %2653 = vmatprep.subr.bf16.mxu0 %v2858_v0 }
  0x8e   :  { %2635 = vmatprep.mubr.msk.bf16.mxu1 %vm2859_vm0, %v2858_v0  ;;  %2688 = vmatpush3.bf16.msra.mxu1 %v2838_v21 }
  0x8f   :  { %2689 = vmatprep.subr.bf16.mxu1 %v2858_v0 }
  0x90   :  { %2654 = vmatpush3.bf16.msra.mxu0 %v2843_v30 }
  0x91   :  { %2711 = vmatprep.subr.bf16.mxu0 %v2858_v0 }
  0x92   :  { %2600 = vmatmul.mubr.bf16.gmra.mxu0 %v1057_v6  ;;  %2690 = vmatpush3.bf16.msra.mxu1 %v2840_v63 }
  0x93   :  { %2655 = vmatprep.mubr.msk.bf16.mxu0 %vm2859_vm0, %v2858_v0  ;;  %2747 = vmatprep.subr.bf16.mxu1 %v2858_v0 }
  0x95   :  { %2636 = vmatmul.mubr.bf16.gmra.mxu1 %v1221_v7 }
  0x96   :  { %2691 = vmatprep.mubr.msk.bf16.mxu1 %vm2859_vm0, %v2858_v0 }
  0xe2   :  { %v453_v29 = vpop.f32.mrf.mxu0  ;;  %v601_v31 = vpop.f32.mrf.mxu1 }
  0xe3   :  { %v3497_v34 = vadd.f32 %v601_v31, %v453_v29 }
  0xe4   :  { %v2441_v33 = vpop.f32.mrf.mxu0  ;;  %v2477_v17 = vpop.f32.mrf.mxu1 }
  0xe6   :  { %v456_v36 = vpop.f32.mrf.mxu0  ;;  %v604_v37 = vpop.f32.mrf.mxu1 }
  0xe7   :  { %v3500_v59 = vadd.f32 %v604_v37, %v456_v36 }
  0xe8   :  { %v2442_v38 = vpop.f32.mrf.mxu0  ;;  %v2478_v40 = vpop.f32.mrf.mxu1 }
  0xea   :  { %v461_v41 = vpop.f32.mrf.mxu0  ;;  %v609_v42 = vpop.f32.mrf.mxu1 }
  0xeb   :  { %v3502_v45 = vadd.f32 %v609_v42, %v461_v41 }
  0xec   :  { %v2445_v44 = vpop.f32.mrf.mxu0  ;;  %v2481_v47 = vpop.f32.mrf.mxu1 }
  0xee   :  { %v464_v48 = vpop.f32.mrf.mxu0  ;;  %v612_v49 = vpop.f32.mrf.mxu1 }
  0xef   :  { %v3504_v52 = vadd.f32 %v612_v49, %v464_v48 }
  0xf0   :  { %v2446_v50 = vpop.f32.mrf.mxu0  ;;  %v2482_v35 = vpop.f32.mrf.mxu1 }
  0xf2   :  { %v469_v53 = vpop.f32.mrf.mxu0  ;;  %v617_v56 = vpop.f32.mrf.mxu1 }
  0xf3   :  { %v3506_v15 = vadd.f32 %v617_v56, %v469_v53 }
  0xf4   :  { %v2449_v27 = vpop.f32.mrf.mxu0  ;;  %v2485_v51 = vpop.f32.mrf.mxu1 }
  0xf6   :  { %v472_v54 = vpop.f32.mrf.mxu0  ;;  %v620_v28 = vpop.f32.mrf.mxu1 }
  0xf7   :  { %v3508_v58 = vadd.f32 %v620_v28, %v472_v54 }
  0xf8   :  { %v2450_v57 = vpop.f32.mrf.mxu0  ;;  %v2486_v60 = vpop.f32.mrf.mxu1 }
  0xfa   :  { %v477_v61 = vpop.f32.mrf.mxu0 }
  0xfc   :  { %v2453_v1 = vpop.f32.mrf.mxu0 }
  0xfd   :  { %v625_v62 = vpop.f32.mrf.mxu1 }
  0xfe   :  { %v3510_v2 = vadd.f32 %v625_v62, %v477_v61  ;;  %v480_v4 = vpop.f32.mrf.mxu0 }
  0xff   :  { %v2489_v3 = vpop.f32.mrf.mxu1 }
 0x100   :  { %v2454_v7 = vpop.f32.mrf.mxu0 }
 0x101   :  { %v628_v6 = vpop.f32.mrf.mxu1 }
 0x102   :  { %v3512_v8 = vadd.f32 %v628_v6, %v480_v4  ;;  %v485_v24 = vpop.f32.mrf.mxu0 }
 0x103   :  { %v2490_v55 = vpop.f32.mrf.mxu1 }
 0x104   :  { %v2457_v9 = vpop.f32.mrf.mxu0 }
 0x105   :  { %v633_v26 = vpop.f32.mrf.mxu1 }
 0x106   :  { %v3514_v10 = vadd.f32 %v633_v26, %v485_v24  ;;  %v488_v46 = vpop.f32.mrf.mxu0 }
 0x107   :  { %v2493_v12 = vpop.f32.mrf.mxu1 }
 0x108   :  { %v2458_v14 = vpop.f32.mrf.mxu0 }
 0x109   :  { %v636_v13 = vpop.f32.mrf.mxu1 }
 0x10a   :  { %v787_v18 = vpop.f32.mrf.mxu0 }
 0x10b   :  { %v2494_v16 = vpop.f32.mrf.mxu1  ;;  %v825_v4 = vadd.f32 %v787_v18, %v3497_v34 }
 0x10c   :  { %v2513_v21 = vpop.f32.mrf.mxu0  ;;  %v3537_v16 = vld [vmem:[%s3759_s4] ss:$0 sm:$0xff] }
 0x10d   :  { %v981_v20 = vpop.f32.mrf.mxu1 }
 0x10e   :  { %v790_v63 = vpop.f32.mrf.mxu0  ;;  %v1019_v26 = vadd.f32 %v981_v20, %v825_v4 }
 0x10f   :  { %v2549_v22 = vpop.f32.mrf.mxu1  ;;  %v826_v9 = vadd.f32 %v790_v63, %v3500_v59 }
 0x110   :  { %v2514_v29 = vpop.f32.mrf.mxu0 }
 0x111   :  { %v984_v25 = vpop.f32.mrf.mxu1 }
 0x112   :  { %v795_v31 = vpop.f32.mrf.mxu0  ;;  %v1020_v22 = vadd.f32 %v984_v25, %v826_v9  ;;  %v1498_v9 = vld [vmem:[#allocation4] sm:$0xf] }
 0x113   :  { %v2550_v30 = vpop.f32.mrf.mxu1  ;;  %v827_v34 = vadd.f32 %v795_v31, %v3502_v45 }
 0x114   :  { %v2517_v17 = vpop.f32.mrf.mxu0 }
 0x115   :  { %v989_v33 = vpop.f32.mrf.mxu1 }
 0x116   :  { %v798_v37 = vpop.f32.mrf.mxu0 }
 0x117   :  { %v2553_v36 = vpop.f32.mrf.mxu1  ;;  %v828_v59 = vadd.f32 %v798_v37, %v3504_v52 }
 0x118   :  { %v2518_v40 = vpop.f32.mrf.mxu0 }
 0x119   :  { %v992_v38 = vpop.f32.mrf.mxu1  ;;  %v1021_v40 = vadd.f32 %v989_v33, %v827_v34 }
 0x11a   :  { %v803_v42 = vpop.f32.mrf.mxu0  ;;  %v1022_v45 = vadd.f32 %v992_v38, %v828_v59 }
 0x11b   :  { %v2554_v41 = vpop.f32.mrf.mxu1 }
 0x11c   :  { %v2521_v47 = vpop.f32.mrf.mxu0 }
 0x11d   :  { %v3516_v44 = vpop.f32.mrf.mxu1 }
 0x11e   :  { %v806_v49 = vpop.f32.mrf.mxu0 }
 0x11f   :  { %v2557_v48 = vpop.f32.mrf.mxu1 }
 0x120   :  { %v2522_v35 = vpop.f32.mrf.mxu0 }
 0x121   :  { %v3518_v50 = vpop.f32.mrf.mxu1 }
 0x122   :  { %v3520_v27 = vpop.f32.mrf.mxu0 }
 0x123   :  { %v2558_v53 = vpop.f32.mrf.mxu1  ;;  %v831_v59 = vadd.f32 %v3520_v27, %v3510_v2 }
 0x124   :  { %v2525_v56 = vpop.f32.mrf.mxu0 }
 0x125   :  { %v3522_v54 = vpop.f32.mrf.mxu1 }
 0x126   :  { %v3524_v51 = vpop.f32.mrf.mxu0 }
 0x127   :  { %v2561_v57 = vpop.f32.mrf.mxu1 }
 0x128   :  { %v2526_v60 = vpop.f32.mrf.mxu0 }
 0x129   :  { %v3526_v28 = vpop.f32.mrf.mxu1  ;;  %v829_v60 = vadd.f32 %v803_v42, %v3506_v15 }
 0x12a   :  { %v3528_v62 = vpop.f32.mrf.mxu0 }
 0x12b   :  { %v2562_v61 = vpop.f32.mrf.mxu1 }
 0x12c   :  { %v2529_v3 = vpop.f32.mrf.mxu0 }
 0x12d   :  { %v3530_v1 = vpop.f32.mrf.mxu1 }
 0x12e   :  { %v822_v7 = vpop.f32.mrf.mxu0 }
 0x12f   :  { %v2565_v6 = vpop.f32.mrf.mxu1 }
 0x130   :  { %v2530_v24 = vpop.f32.mrf.mxu0 }
 0x131   :  { %v1016_v55 = vpop.f32.mrf.mxu1 }
 0x132   :  { %v1146_v46 = vpop.f32.mrf.mxu0 }
 0x133   :  { %v2566_v12 = vpop.f32.mrf.mxu1  ;;  %v1184_v13 = vadd.f32 %v1146_v46, %v1019_v26  ;;  %v830_v26 = vadd.f32 %v806_v49, %v3508_v58  ;;  %v1023_v46 = vadd.f32 %v3516_v44, %v829_v60 }
 0x134   :  { %v2585_v21 = vpop.f32.mrf.mxu0 }
 0x135   :  { %v1310_v14 = vpop.f32.mrf.mxu1 }
 0x136   :  { %v1348_v18 = vadd.f32 %v1310_v14, %v1184_v13  ;;  %v1149_v30 = vpop.f32.mrf.mxu0 }
 0x137   :  { %v2621_v29 = vpop.f32.mrf.mxu1  ;;  %v1185_v17 = vadd.f32 %v1149_v30, %v1020_v22 }
 0x138   :  { %v1364_v20 = vadd.f32 %v3537_v16, %v1348_v18  ;;  %v2586_v36 = vpop.f32.mrf.mxu0 }
 0x139   :  { %v1313_v63 = vpop.f32.mrf.mxu1 }
 0x13a   :  { %v1373_v41 = vmax.f32 %v1364_v20, 0.0  ;;  %v1349_v47 = vadd.f32 %v1313_v63, %v1185_v17  ;;  %v1154_v35 = vpop.f32.mrf.mxu0  ;;  %v1024_v20 = vadd.f32 %v3518_v50, %v830_v26 }
 0x13b   :  { %v2622_v48 = vpop.f32.mrf.mxu1  ;;  %v1186_v56 = vadd.f32 %v1154_v35, %v1021_v40  ;;  %v832_v35 = vadd.f32 %v3524_v51, %v3512_v8 }
 0x13c   :  { %v2297_v53 = vpack.c.bf16 %v1373_v41, %v1373_v41  ;;  %v1365_v25 = vadd.f32 %v3537_v16, %v1349_v47  ;;  %v2589_v57 = vpop.f32.mrf.mxu0 }
 0x13d   :  { %v1318_v31 = vpop.f32.mrf.mxu1  ;;  %v1025_v57 = vadd.f32 %v3522_v54, %v831_v59 }
 0x13e   :  { %v1411_v61 = vshrl.u32 %v2297_v53, 16  ;;  %v1374_v3 = vmax.f32 %v1365_v25, 0.0  ;;  %v1350_v4 = vadd.f32 %v1318_v31, %v1186_v56  ;;  %v1414_v52 = vshll.u32 %v2297_v53, 16  ;;  %v1157_v6 = vpop.f32.mrf.mxu0 }
 0x13f   :  { %v2625_v37 = vpop.f32.mrf.mxu1  ;;  %v1187_v24 = vadd.f32 %v1157_v6, %v1022_v45 }
 0x140   :  { %v1413_v33 = vrot.slane %v1411_v61, 7  ;;  %v2298_v7 = vpack.c.bf16 %v1374_v3, %v1374_v3  ;;  %v1366_v55 = vadd.f32 %v3537_v16, %v1350_v4  ;;  %v2590_v38 = vpop.f32.mrf.mxu0  ;;  %v1026_v37 = vadd.f32 %v3526_v28, %v832_v35  ;;  %v3576_v35 = vld [vmem:[%s3758_s5 + $0xb8] sm:$0xff]  }
 0x141   :  { %v1321_v12 = vpop.f32.mrf.mxu1 }
 0x142   :  { %v1416_v13 = vor.u32 %v1414_v52, %v1413_v33  ;;  %v1419_v15 = vshrl.u32 %v2298_v7, 16  ;;  %v1375_v42 = vmax.f32 %v1366_v55, 0.0  ;;  %v1351_v14 = vadd.f32 %v1321_v12, %v1187_v24  ;;  %v1162_v22 = vpop.f32.mrf.mxu0 }
 0x143   :  { %v2626_v21 = vpop.f32.mrf.mxu1  ;;  %v1422_v29 = vshll.u32 %v2298_v7, 16  ;;  %v1188_v30 = vadd.f32 %v1162_v22, %v1023_v46  ;;  %v1417_v63 = vrot.slane %v1413_v33, 4  ;;  %v833_v46 = vadd.f32 %v3528_v62, %v3514_v10 }
 0x144   :  { %v1499_v34 = vsel %vm2992_vm8, %v1416_v13, %v1498_v9  ;;  %v1421_v18 = vrot.slane %v1419_v15, 7  ;;  %v2299_v58 = vpack.c.bf16 %v1375_v42, %v1375_v42  ;;  %v1367_v49 = vadd.f32 %v3537_v16, %v1351_v14  ;;  %v2593_v44 = vpop.f32.mrf.mxu0 }
 0x145   :  { %1500 = vst [vmem:[#allocation4] sm:$0xf] %v1499_v34  ;;  %v1326_v17 = vpop.f32.mrf.mxu1  ;;  %v1027_v62 = vadd.f32 %v3530_v1, %v833_v46 }
 0x146   :  { %v1424_v36 = vor.u32 %v1422_v29, %v1421_v18  ;;  %v1352_v40 = vadd.f32 %v1326_v17, %v1188_v30  ;;  %v1428_v41 = vshrl.u32 %v2299_v58, 16  ;;  %v1376_v39 = vmax.f32 %v1367_v49, 0.0  ;;  %v1165_v48 = vpop.f32.mrf.mxu0 }
 0x147   :  { %v2629_v47 = vpop.f32.mrf.mxu1  ;;  %v1189_v25 = vadd.f32 %v1165_v48, %v1024_v20  ;;  %v1431_v45 = vshll.u32 %v2299_v58, 16  ;;  %v1426_v3 = vrot.slane %v1421_v18, 4 }
 0x148   :  { %v1425_v50 = vsel %vm2984_vm7, %v1417_v63, %v1424_v36  ;;  %v1368_v53 = vadd.f32 %v3537_v16, %v1352_v40  ;;  %v1430_v56 = vrot.slane %v1428_v41, 7  ;;  %v2300_v2 = vpack.c.bf16 %v1376_v39, %v1376_v39  ;;  %v2594_v31 = vpop.f32.mrf.mxu0 }
 0x149   :  { %1501 = vst [vmem:[#allocation4 + $0x4] sm:$0xf] %v1425_v50  ;;  %v1329_v27 = vpop.f32.mrf.mxu1 }
 0x14a   :  { %v1377_v60 = vmax.f32 %v1368_v53, 0.0  ;;  %v1353_v61 = vadd.f32 %v1329_v27, %v1189_v25  ;;  %v1433_v4 = vor.u32 %v1431_v45, %v1430_v56  ;;  %v1437_v52 = vshrl.u32 %v2300_v2, 16  ;;  %v1170_v51 = vpop.f32.mrf.mxu0 }
 0x14b   :  { %v2630_v8 = vpop.f32.mrf.mxu1  ;;  %v1190_v55 = vadd.f32 %v1170_v51, %v1025_v57  ;;  %v1440_v9 = vshll.u32 %v2300_v2, 16  ;;  %v1435_v42 = vrot.slane %v1430_v56, 4 }
 0x14c   :  { %v1511_v6 = vld [vmem:[#allocation4] sm:$0x1]  ;;  %v2301_v33 = vpack.c.bf16 %v1377_v60, %v1377_v60  ;;  %v1369_v7 = vadd.f32 %v3537_v16, %v1353_v61  ;;  %v1434_v54 = vsel %vm2984_vm7, %v1426_v3, %v1433_v4  ;;  %v1439_v26 = vrot.slane %v1437_v52, 7  ;;  %v2597_v38 = vpop.f32.mrf.mxu0 }
 0x14d   :  { %v1512_v24 = vsel %vm2946_vm4, 0, %v1511_v6  ;;  %v1334_v12 = vpop.f32.mrf.mxu1  ;;  %1502 = vst [vmem:[#allocation4 + $0x8] sm:$0xf] %v1434_v54  ;;  %v2846_v54 = vld [vmem:[%s3758_s5 + $0xb0] sm:$0xff]  }
 0x14e   :  { %1513 = vst [vmem:[#allocation4] sm:$0x1] %v1512_v24  ;;  %v1446_v28 = vshrl.u32 %v2301_v33, 16  ;;  %v1378_v13 = vmax.f32 %v1369_v7, 0.0  ;;  %v1354_v15 = vadd.f32 %v1334_v12, %v1190_v55  ;;  %v1442_v14 = vor.u32 %v1440_v9, %v1439_v26  ;;  %v1173_v22 = vpop.f32.mrf.mxu0 }
 0x14f   :  { %v1449_v21 = vshll.u32 %v2301_v33, 16  ;;  %v2633_v11 = vpop.f32.mrf.mxu1  ;;  %v1191_v30 = vadd.f32 %v1173_v22, %v1026_v37  ;;  %v1444_v49 = vrot.slane %v1439_v26, 4 }
 0x150   :  { %v1448_v34 = vrot.slane %v1446_v28, 7  ;;  %v2302_v18 = vpack.c.bf16 %v1378_v13, %v1378_v13  ;;  %v1370_v29 = vadd.f32 %v3537_v16, %v1354_v15  ;;  %v1443_v20 = vsel %vm2984_vm7, %v1435_v42, %v1442_v14  ;;  %v2598_v10 = vpop.f32.mrf.mxu0  ;;  %v3579_v45 = vld [vmem:[#allocation4 + $0x4] sm:$0xf] }
 0x151   :  { %v1337_v58 = vpop.f32.mrf.mxu1  ;;  %1503 = vst [vmem:[#allocation4 + $0xc] sm:$0xf] %v1443_v20 }
 0x152   :  { %v1451_v17 = vor.u32 %v1449_v21, %v1448_v34  ;;  %v1455_v44 = vshrl.u32 %v2302_v18, 16  ;;  %v1379_v59 = vmax.f32 %v1370_v29, 0.0  ;;  %v1355_v63 = vadd.f32 %v1337_v58, %v1191_v30  ;;  %v1178_v40 = vpop.f32.mrf.mxu0 }
 0x153   :  { %v2634_v36 = vpop.f32.mrf.mxu1  ;;  %v1458_v47 = vshll.u32 %v2302_v18, 16  ;;  %v1192_v48 = vadd.f32 %v1178_v40, %v1027_v62  ;;  %v1453_v2 = vrot.slane %v1448_v34, 4 }
 0x154   :  { %v1452_v41 = vsel %vm2984_vm7, %v1444_v49, %v1451_v17  ;;  %v1457_v39 = vrot.slane %v1455_v44, 7  ;;  %v2303_v1 = vpack.c.bf16 %v1379_v59, %v1379_v59  ;;  %v1371_v50 = vadd.f32 %v3537_v16, %v1355_v63  ;;  %v2601_v25 = vpop.f32.mrf.mxu0  ;;  %v1508_v63 = vld [vmem:[#allocation4 + $0x20] sm:$0x3]  ;;  %v2849_v36 = vld [vmem:[%s3758_s5 + $0xa0] sm:$0xff]  }
 0x155   :  { %1504 = vst [vmem:[#allocation4 + $0x10] sm:$0xf] %v1452_v41  ;;  %v1342_v53 = vpop.f32.mrf.mxu1  ;;  %v1523_v56 = vld [vmem:[#allocation4] sm:$0xf] }
 0x156   :  { %v1460_v27 = vor.u32 %v1458_v47, %v1457_v39  ;;  %v1356_v31 = vadd.f32 %v1342_v53, %v1192_v48  ;;  %v2244_v57 = vcombine.low %v1523_v56, %v3579_v45  ;;  %v1464_v60 = vshrl.u32 %v2303_v1, 16  ;;  %v1181_v4 = vpop.f32.mrf.mxu0  ;;  %v2851_v47 = vld [vmem:[%s3758_s5 + $0x98] sm:$0xff]  }
 0x157   :  { %v1380_v61 = vmax.f32 %v1371_v50, 0.0  ;;  %v2637_v3 = vpop.f32.mrf.mxu1  ;;  %v1467_v6 = vshll.u32 %v2303_v1, 16  ;;  %v1462_v12 = vrot.slane %v1457_v39, 4  ;;  %v2852_v50 = vld [vmem:[%s3758_s5 + $0x90] sm:$0xff]  }
 0x158   :  { %v1461_v52 = vsel %vm2984_vm7, %v1453_v2, %v1460_v27  ;;  %v1372_v8 = vadd.f32 %v3537_v16, %v1356_v31  ;;  %2692 = vmatmul.mubr.bf16.vlgmr.msra.gmra.mxu1 %v2244_v57  ;;  %v1592_v51 = vshll.u32 %v2244_v57, 16  ;;  %v1466_v37 = vrot.slane %v1464_v60, 7  ;;  %v2602_v55 = vpop.f32.mrf.mxu0  ;;  %v3587_v24 = vld [vmem:[#allocation4 + $0x8] sm:$0xff]   ;;  %v2854_v31 = vld [vmem:[%s3758_s5 + $0x88] sm:$0xff]  }
 0x159   :  { %1505 = vst [vmem:[#allocation4 + $0x14] sm:$0xf] %v1461_v52  ;;  %v2304_v33 = vpack.c.bf16 %v1380_v61, %v1380_v61  ;;  %v1345_v7 = vpop.f32.mrf.mxu1  ;;  %2695 = vmatprep.mubr.msk.bf16.mxu1 %vm2859_vm0, %v2858_v0  ;;  %2755 = vmatpush3.bf16.msra.mxu1 %v3576_v35  ;;  %v1590_v26 = vshrl.u32 %v2244_v57, 16  ;;  %v1597_v11 = vshll.u32 %v3587_v24, 16  ;;  %v1601_v48 = vshrl.u32 %v3587_v24, 16 }
 0x15a   :  { %v1381_v16 = vmax.f32 %v1372_v8, 0.0  ;;  %v1594_v9 = vrot.slane %v1592_v51, 1  ;;  %2748 = vmatprep.subr.bf16.mxu1 %v2858_v0  ;;  %v1469_v38 = vor.u32 %v1467_v6, %v1466_v37  ;;  %v1471_v58 = vrot.slane %v1466_v37, 4 }
 0x15b   :  { %v1473_v46 = vshrl.u32 %v2304_v33, 16  ;;  %v2638_v28 = vpop.f32.mrf.mxu1  ;;  %v1476_v42 = vshll.u32 %v2304_v33, 16  ;;  %v1599_v20 = vrot.slane %v1597_v11, 1 }
 0x15c   :  { %v1514_v13 = vld [vmem:[#allocation4 + $0x10] sm:$0x1]  ;;  %v1517_v15 = vld [vmem:[#allocation4 + $0x10] sm:$0x2]  ;;  %v2305_v14 = vpack.c.bf16 %v1381_v16, %v1381_v16  ;;  %v1595_v21 = vor.u32 %v1594_v9, %v1590_v26  ;;  %v1470_v18 = vsel %vm2984_vm7, %v1462_v12, %v1469_v38  ;;  %v1881_v26 = vld [vmem:[#allocation4] sm:$0xe] }
 0x15d   :  { %v1515_v22 = vsel %vm3083_vm14, 0, %v1514_v13  ;;  %v1518_v34 = vsel %vm3040_vm11, 0, %v1517_v15  ;;  %v1475_v29 = vrot.slane %v1473_v46, 7  ;;  %2756 = vmatpush3.bf16.msra.mxu1 %v2846_v54  ;;  %1506 = vst [vmem:[#allocation4 + $0x18] sm:$0xf] %v1470_v18  ;;  %v1603_v32 = vor.u32 %v1601_v48, %v1599_v20 }
 0x15e   :  { %1516 = vst [vmem:[#allocation4 + $0x10] sm:$0x1] %v1515_v22  ;;  %1519 = vst [vmem:[#allocation4 + $0x10] sm:$0x2] %v1518_v34  ;;  %v1482_v30 = vshrl.u32 %v2305_v14, 16  ;;  %2749 = vmatprep.subr.bf16.mxu1 %v2858_v0  ;;  %v1485_v62 = vshll.u32 %v2305_v14, 16  ;;  %v1600_v49 = vsel %vm660_vm9, %v1595_v21, %v1599_v20  ;;  %v2282_v9 = vcombine.low %v1881_v26, %v3579_v45 }
 0x15f   :  { %v1478_v10 = vor.u32 %v1476_v42, %v1475_v29  ;;  %2656 = vmatmul.mubr.bf16.vlgmr.msra.gmra.mxu0 %v1600_v49  ;;  %v1480_v44 = vrot.slane %v1475_v29, 4  ;;  %v1903_v12 = vrot.slane %v3587_v24, 1 }
 0x160   :  { %v1484_v19 = vrot.slane %v1482_v30, 7  ;;  %2696 = vmatmul.mubr.bf16.gmra.mxu1 %v3587_v24  ;;  %2712 = vmatpush3.bf16.msra.mxu0 %v3576_v35  ;;  %v1902_v38 = vrot.slane %v2282_v9, 1 }
 0x161   :  { %v1479_v17 = vsel %vm2984_vm7, %v1471_v58, %v1478_v10  ;;  %2699 = vmatprep.mubr.msk.bf16.mxu1 %vm2859_vm0, %v2858_v0  ;;  %2757 = vmatpush3.bf16.msra.mxu1 %v2848_v43 }
 0x162   :  { %1507 = vst [vmem:[#allocation4 + $0x1c] sm:$0xf] %v1479_v17  ;;  %v1487_v59 = vor.u32 %v1485_v62, %v1484_v19  ;;  %2713 = vmatprep.subr.bf16.mxu0 %v2858_v0  ;;  %2659 = vmatprep.mubr.msk.bf16.mxu0 %vm2859_vm0, %v2858_v0  ;;  %v1904_v46 = vsel %vm1049_vm10, %v1902_v38, %v1903_v12 }
 0x163   :  { %2750 = vmatprep.subr.bf16.mxu1 %v2858_v0 }
 0x164   :  { %v1488_v40 = vsel %vm2984_vm7, %v1480_v44, %v1487_v59  ;;  %2714 = vmatpush3.bf16.msra.mxu0 %v2846_v54 }
 0x165   :  { %v1509_v41 = vsel %vm3192_vm5, %v1488_v40, %v1508_v63  ;;  %v3623_v39 = vld [vmem:[#allocation4 + $0x10] sm:$0xff]   ;;  %2758 = vmatpush3.bf16.msra.mxu1 %v2849_v36  ;;  %2715 = vmatprep.subr.bf16.mxu0 %v2858_v0 }
 0x166   :  { %1510 = vst [vmem:[#allocation4 + $0x20] sm:$0x3] %v1509_v41  ;;  %v1605_v35 = vshll.u32 %v3623_v39, 16  ;;  %2751 = vmatprep.subr.bf16.mxu1 %v2858_v0  ;;  %v1609_v2 = vshrl.u32 %v3623_v39, 16  ;;  %v1905_v28 = vrot.slane %v3623_v39, 1 }
 0x168   :  { %2700 = vmatmul.mubr.bf16.gmra.mxu1 %v3623_v39  ;;  %v1607_v5 = vrot.slane %v1605_v35, 1  ;;  %2716 = vmatpush3.bf16.msra.mxu0 %v2848_v43  ;;  %v1906_v13 = vsel %vm1049_vm10, %v1903_v12, %v1905_v28 }
 0x169   :  { %2703 = vmatprep.mubr.msk.bf16.mxu1 %vm2859_vm0, %v2858_v0  ;;  %v3635_v1 = vld [vmem:[#allocation4 + $0x18] sm:$0xff]   ;;  %2759 = vmatpush3.bf16.msra.mxu1 %v2851_v47 }
 0x16a   :  { %v1608_v53 = vsel %vm660_vm9, %v1603_v32, %v1607_v5  ;;  %2752 = vmatprep.subr.bf16.mxu1 %v2858_v0  ;;  %v1613_v25 = vshll.u32 %v3635_v1, 16  ;;  %2717 = vmatprep.subr.bf16.mxu0 %v2858_v0  ;;  %v1611_v57 = vor.u32 %v1609_v2, %v1607_v5  ;;  %v1617_v52 = vshrl.u32 %v3635_v1, 16 }
 0x16b   :  { %2660 = vmatmul.mubr.bf16.gmra.mxu0 %v1608_v53  ;;  %v1907_v7 = vrot.slane %v3635_v1, 1 }
 0x16c   :  { %2663 = vmatprep.mubr.msk.bf16.mxu0 %vm2859_vm0, %v2858_v0  ;;  %2718 = vmatpush3.bf16.msra.mxu0 %v2849_v36  ;;  %v1615_v60 = vrot.slane %v1613_v25, 1 }
 0x16d   :  { %v1520_v56 = vld [vmem:[#allocation4 + $0x20] sm:$0x2]  ;;  %2760 = vmatpush3.bf16.msra.mxu1 %v2852_v50  ;;  %2719 = vmatprep.subr.bf16.mxu0 %v2858_v0  ;;  %v2853_v3 = vld [vmem:[#allocation4 + $0x20] ss:$0 sps:$4 sm:$0x11]   ;;  %v1908_v45 = vsel %vm1049_vm10, %v1905_v28, %v1907_v7 }
 0x16e   :  { %v1521_v27 = vsel %vm3229_vm6, 0, %v1520_v56  ;;  %2753 = vmatprep.subr.bf16.mxu1 %v2858_v0  ;;  %v1616_v61 = vsel %vm660_vm9, %v1611_v57, %v1615_v60  ;;  %v2856_v4 = vld [vmem:[#allocation4 + $0x20] ss:$0 sps:$4 sm:$0x33]   ;;  %v1619_v51 = vor.u32 %v1617_v52, %v1615_v60  ;;  %v3708_v56 = vld [vmem:[%s3760_s6] ss:$0 sm:$0xff] }
 0x16f   :  { %1522 = vst [vmem:[#allocation4 + $0x20] sm:$0x2] %v1521_v27  ;;  %v1621_v8 = vshll.u32 %v2856_v4, 16  ;;  %v1909_v6 = vrot.slane %v2856_v4, 1  ;;  %v1625_v54 = vshrl.u32 %v2856_v4, 16 }
 0x170   :  { %2704 = vmatmul.mubr.bf16.gmra.mxu1 %v3635_v1  ;;  %2720 = vmatpush3.bf16.msra.mxu0 %v2851_v47 }
 0x171   :  { %2707 = vmatprep.mubr.msk.bf16.mxu1 %vm2859_vm0, %v2858_v0  ;;  %2761 = vmatpush3.bf16.msra.mxu1 %v2854_v31  ;;  %v1623_v37 = vrot.slane %v1621_v8, 1  ;;  %v1910_v55 = vsel %vm1049_vm10, %v1907_v7, %v1909_v6 }
 0x172   :  { %2754 = vmatprep.subr.bf16.mxu1 %v2858_v0  ;;  %2721 = vmatprep.subr.bf16.mxu0 %v2858_v0 }
 0x173   :  { %2664 = vmatmul.mubr.bf16.gmra.mxu0 %v1616_v61  ;;  %v1624_v33 = vsel %vm660_vm9, %v1619_v51, %v1623_v37  ;;  %v1627_v16 = vor.u32 %v1625_v54, %v1623_v37 }
 0x174   :  { %2667 = vmatprep.mubr.msk.bf16.mxu0 %vm2859_vm0, %v2858_v0  ;;  %2722 = vmatpush3.bf16.msra.mxu0 %v2852_v50 }
 0x175   :  { %2762 = vmatpush3.bf16.msra.mxu1 %v2855_v23  ;;  %2723 = vmatprep.subr.bf16.mxu0 %v2858_v0 }
 0x178   :  { %2708 = vmatmul.mubr.bf16.gmra.mxu1 %v2853_v3  ;;  %2724 = vmatpush3.bf16.msra.mxu0 %v2854_v31 }
 0x179   :  { %2739 = vmatprep.mubr.msk.bf16.mxu1 %vm2859_vm0, %v2858_v0  ;;  %2725 = vmatprep.subr.bf16.mxu0 %v2858_v0 }
 0x17b   :  { %2668 = vmatmul.mubr.bf16.gmra.mxu0 %v1624_v33 }
 0x17c   :  { %2671 = vmatprep.mubr.msk.bf16.mxu0 %vm2859_vm0, %v2858_v0  ;;  %2726 = vmatpush3.bf16.msra.mxu0 %v2855_v23 }
 0x180   :  { %2740 = vmatmul.mubr.bf16.vlgmr.msra.gmra.mxu1 %v1910_v55 }
 0x181   :  { %2743 = vmatprep.mubr.msk.bf16.mxu1 %vm2859_vm0, %v2858_v0 }
 0x183   :  { %2672 = vmatmul.mubr.bf16.gmra.mxu0 %v1627_v16 }
 0x184   :  { %2727 = vmatprep.mubr.msk.bf16.mxu0 %vm2859_vm0, %v2858_v0 }
 0x188   :  { %2744 = vmatmul.mubr.bf16.gmra.mxu1 %v1909_v6 }
 0x18b   :  { %2728 = vmatmul.mubr.bf16.vlgmr.msra.gmra.mxu0 %v1904_v46 }
 0x18c   :  { %2731 = vmatprep.mubr.msk.bf16.mxu0 %vm2859_vm0, %v2858_v0 }
 0x193   :  { %2732 = vmatmul.mubr.bf16.gmra.mxu0 %v1906_v13 }
 0x194   :  { %2735 = vmatprep.mubr.msk.bf16.mxu0 %vm2859_vm0, %v2858_v0 }
 0x19b   :  { %2736 = vmatmul.mubr.bf16.gmra.mxu0 %v1908_v45 }
 0x218   :  { %v1843_v15 = vpop.f32.mrf.mxu1 }
 0x21a   :  { %v2693_v24 = vpop.f32.mrf.mxu1 }
 0x21c   :  { %v3689_v42 = vpop.f32.mrf.mxu1 }
 0x21e   :  { %v2694_v14 = vpop.f32.mrf.mxu1 }
 0x21f   :  { %v1715_v11 = vpop.f32.mrf.mxu0 }
 0x220   :  { %v3691_v21 = vpop.f32.mrf.mxu1  ;;  %v1844_v12 = vadd.f32 %v1843_v15, %v1715_v11 }
 0x221   :  { %v2657_v34 = vpop.f32.mrf.mxu0 }
 0x222   :  { %v2697_v22 = vpop.f32.mrf.mxu1 }
 0x223   :  { %v1718_v29 = vpop.f32.mrf.mxu0 }
 0x224   :  { %v3693_v18 = vpop.f32.mrf.mxu1  ;;  %v1847_v14 = vadd.f32 %v3689_v42, %v1718_v29 }
 0x225   :  { %v2658_v20 = vpop.f32.mrf.mxu0 }
 0x226   :  { %v2698_v30 = vpop.f32.mrf.mxu1 }
 0x228   :  { %v3695_v43 = vpop.f32.mrf.mxu1 }
 0x22a   :  { %v2701_v0 = vpop.f32.mrf.mxu1 }
 0x22b   :  { %v1723_v10 = vpop.f32.mrf.mxu0 }
 0x22c   :  { %v3697_v58 = vpop.f32.mrf.mxu1  ;;  %v1852_v15 = vadd.f32 %v3691_v21, %v1723_v10 }
 0x22d   :  { %v2661_v62 = vpop.f32.mrf.mxu0 }
 0x22e   :  { %v2702_v19 = vpop.f32.mrf.mxu1 }
 0x22f   :  { %v3699_v17 = vpop.f32.mrf.mxu0 }
 0x230   :  { %v1867_v49 = vpop.f32.mrf.mxu1  ;;  %v1855_v42 = vadd.f32 %v3693_v18, %v3699_v17 }
 0x231   :  { %v2662_v59 = vpop.f32.mrf.mxu0 }
 0x232   :  { %v2705_v44 = vpop.f32.mrf.mxu1 }
 0x233   :  { %v3701_v36 = vpop.f32.mrf.mxu0 }
 0x234   :  { %v1870_v63 = vpop.f32.mrf.mxu1 }
 0x235   :  { %v2665_v41 = vpop.f32.mrf.mxu0 }
 0x236   :  { %v2706_v40 = vpop.f32.mrf.mxu1 }
 0x237   :  { %v3703_v47 = vpop.f32.mrf.mxu0  ;;  %v1860_v40 = vadd.f32 %v3695_v43, %v3701_v36 }
 0x238   :  { %v1875_v39 = vpop.f32.mrf.mxu1 }
 0x239   :  { %v2666_v35 = vpop.f32.mrf.mxu0 }
 0x23a   :  { %v2709_v48 = vpop.f32.mrf.mxu1  ;;  %v1863_v35 = vadd.f32 %v3697_v58, %v3703_v47 }
 0x23b   :  { %v1739_v5 = vpop.f32.mrf.mxu0 }
 0x23c   :  { %v1878_v32 = vpop.f32.mrf.mxu1  ;;  %v1868_v1 = vadd.f32 %v1867_v49, %v1739_v5 }
 0x23d   :  { %v2669_v53 = vpop.f32.mrf.mxu0 }
 0x23e   :  { %v2710_v50 = vpop.f32.mrf.mxu1 }
 0x23f   :  { %v1742_v27 = vpop.f32.mrf.mxu0 }
 0x240   :  { %v2022_v25 = vpop.f32.mrf.mxu1  ;;  %v1871_v31 = vadd.f32 %v1870_v63, %v1742_v27 }
 0x241   :  { %v2042_v2 = vadd.f32 %v2022_v25, %v1868_v1  ;;  %v2670_v23 = vpop.f32.mrf.mxu0 }
 0x242   :  { %v2741_v57 = vpop.f32.mrf.mxu1 }
 0x243   :  { %v2058_v60 = vadd.f32 %v3708_v56, %v2042_v2  ;;  %v1747_v52 = vpop.f32.mrf.mxu0 }
 0x244   :  { %v2025_v61 = vpop.f32.mrf.mxu1  ;;  %v1876_v8 = vadd.f32 %v1875_v39, %v1747_v52 }
 0x245   :  { %v2067_v3 = vmax.f32 %v2058_v60, 0.0  ;;  %v2043_v4 = vadd.f32 %v2025_v61, %v1871_v31  ;;  %v2673_v6 = vpop.f32.mrf.mxu0 }
 0x246   :  { %v2742_v51 = vpop.f32.mrf.mxu1 }
 0x247   :  { %2294 = vst [vmem:[%s3761_s7 + $0x2e] sm:$0xff] %v2067_v3  ;;  %v2059_v37 = vadd.f32 %v3708_v56, %v2043_v4  ;;  %v1750_v54 = vpop.f32.mrf.mxu0 }
 0x248   :  { %v2030_v33 = vpop.f32.mrf.mxu1 }
 0x249   :  { %v2068_v7 = vmax.f32 %v2059_v37, 0.0  ;;  %v2044_v55 = vadd.f32 %v2030_v33, %v1876_v8  ;;  %v2674_v9 = vpop.f32.mrf.mxu0 }
 0x24a   :  { %v2745_v16 = vpop.f32.mrf.mxu1 }
 0x24b   :  { %2295 = vst [vmem:[%s3761_s7 + $0x36] sm:$0xff] %v2068_v7  ;;  %v2060_v26 = vadd.f32 %v3708_v56, %v2044_v55  ;;  %v1998_v28 = vpop.f32.mrf.mxu0 }
 0x24c   :  { %v2033_v38 = vpop.f32.mrf.mxu1  ;;  %v2036_v13 = vadd.f32 %v1998_v28, %v1844_v12 }
 0x24d   :  { %v2069_v46 = vmax.f32 %v2060_v26, 0.0  ;;  %v2729_v24 = vpop.f32.mrf.mxu0 }
 0x24e   :  { %v2746_v45 = vpop.f32.mrf.mxu1  ;;  %v2052_v22 = vadd.f32 %v3708_v56, %v2036_v13 }
 0x24f   :  { %2296 = vst [vmem:[%s3761_s7 + $0x3e] sm:$0x3] %v2069_v46  ;;  %v2001_v34 = vpop.f32.mrf.mxu0 }
 0x250   :  { %v2061_v30 = vmax.f32 %v2052_v22, 0.0  ;;  %v2037_v20 = vadd.f32 %v2001_v34, %v1847_v14 }
 0x251   :  { %v2730_v0 = vpop.f32.mrf.mxu0 }
 0x252   :  { %2070 = vst [vmem:[%s3761_s7] sm:$0xff] %v2061_v30  ;;  %v2053_v11 = vadd.f32 %v3708_v56, %v2037_v20 }
 0x253   :  { %v2006_v19 = vpop.f32.mrf.mxu0 }
 0x254   :  { %v2062_v62 = vmax.f32 %v2053_v11, 0.0  ;;  %v2038_v49 = vadd.f32 %v2006_v19, %v1852_v15 }
 0x255   :  { %v2733_v44 = vpop.f32.mrf.mxu0 }
 0x256   :  { %2071 = vst [vmem:[%s3761_s7 + $0x8] sm:$0xff] %v2062_v62  ;;  %v2054_v29 = vadd.f32 %v3708_v56, %v2038_v49 }
 0x257   :  { %v2009_v21 = vpop.f32.mrf.mxu0 }
 0x258   :  { %v2063_v10 = vmax.f32 %v2054_v29, 0.0  ;;  %v2039_v59 = vadd.f32 %v2009_v21, %v1855_v42 }
 0x259   :  { %v2734_v63 = vpop.f32.mrf.mxu0 }
 0x25a   :  { %2072 = vst [vmem:[%s3761_s7 + $0x10] sm:$0xff] %v2063_v10  ;;  %v2055_v41 = vadd.f32 %v3708_v56, %v2039_v59 }
 0x25b   :  { %v2014_v18 = vpop.f32.mrf.mxu0 }
 0x25c   :  { %v2064_v17 = vmax.f32 %v2055_v41, 0.0  ;;  %v2040_v39 = vadd.f32 %v2014_v18, %v1860_v40 }
 0x25d   :  { %v2737_v48 = vpop.f32.mrf.mxu0 }
 0x25e   :  { %2073 = vst [vmem:[%s3761_s7 + $0x18] sm:$0xff] %v2064_v17  ;;  %v2056_v32 = vadd.f32 %v3708_v56, %v2040_v39 }
 0x25f   :  { %v2017_v43 = vpop.f32.mrf.mxu0 }
 0x260   :  { %v2065_v36 = vmax.f32 %v2056_v32, 0.0  ;;  %v2041_v5 = vadd.f32 %v2017_v43, %v1863_v35 }
 0x261   :  { %v2738_v1 = vpop.f32.mrf.mxu0 }
 0x262   :  { %2292 = vst [vmem:[%s3761_s7 + $0x1e] sm:$0xfc] %v2065_v36  ;;  %v2057_v50 = vadd.f32 %v3708_v56, %v2041_v5 }
 0x264   :  { %v2066_v53 = vmax.f32 %v2057_v50, 0.0 }
 0x266   :  { %2293 = vst [vmem:[%s3761_s7 + $0x26] sm:$0xff] %v2066_v53 }

</bundles_post_ra>
